<compile_context>
chip_gen: v5e
topology: v5e:2x2
jax: 0.10.0
libtpu: 0.0.40
codegen_flags: <defaults>
</compile_context>

<pallas_src>
import functools

import jax
import jax.numpy as jnp
from jax import lax
from jax.experimental import pallas as pl
from jax.experimental.pallas import tpu as pltpu


# rho / rhop as used throughout the EP codebase (hard sigmoid + its derivative)
def rho(x):
    return jnp.clip(x, 0.0, 1.0)


def rhop(x):
    return ((x >= 0.0) & (x <= 1.0)).astype(x.dtype)


def _round_up(x, m):
    return ((x + m - 1) // m) * m


def _pad2(x, rows, cols):
    return jnp.pad(x, ((0, rows - x.shape[0]), (0, cols - x.shape[1])))


def _ep_kernel(dt, beta, n_steps, no_clamp, n0p,
               s0_in, s1_in, s2_in, target_ref, data_ref,
               w_out_ref, w_in_ref, w4t_ref, b0_ref, b2_ref, b4_ref,
               s0_out, s1_out, s2_out):
    """Whole T-step EP relaxation for one batch block, in one invocation."""
    f32 = jnp.float32
    bf16 = jnp.bfloat16
    bt = s0_in.shape[0]
    n1p = s1_in.shape[1]

    # ---- loop-invariant drives, computed once -------------------------------
    # Top-of-chain drive  w[-1](rho(data)) + b4  never changes across steps.
    c2 = jnp.dot(rho(data_ref[...]).astype(bf16), w4t_ref[...],
                 preferred_element_type=f32) + b4_ref[...]
    # Constant additive term of the fused (dsdt0 | dsdt2) dot:
    #   columns [:n0p] -> b0 (drive of s0), columns [n0p:] -> c2 (drive of s2).
    drive02 = jnp.concatenate(
        [jnp.broadcast_to(b0_ref[...], (bt, n0p)), c2], axis=1)
    b2b = jnp.broadcast_to(b2_ref[...], (bt, n1p))
    target = target_ref[...]

    # ---- Euler integration of the EP dynamics --------------------------------
    def body(_, carry):
        s0, s1, s2 = carry

        # Fused matmul #1 (shared LHS rho(s1)):
        #   rho(s1) @ [w0.T | w2]  ->  [:, :n0p] drives s0,  [:, n0p:] drives s2
        out02 = jnp.dot(rho(s1).astype(bf16), w_out_ref[...],
                        preferred_element_type=f32) + drive02
        d0 = out02[:, :n0p]
        d2 = out02[:, n0p:]

        # Fused matmul #2 (both terms target layer 1):
        #   [rho(s2) | rho(s0)] @ [[w2.T], [w0]]  ->  drive of s1
        lhs1 = jnp.concatenate([rho(s2), rho(s0)], axis=1).astype(bf16)
        d1 = jnp.dot(lhs1, w_in_ref[...], preferred_element_type=f32) + b2b

        # dsdt[0] = -s0 + w[0](rho(s1))            (+ beta * (target - s0))
        dsdt0 = -s0 + d0
        if beta > 0.0:
            dsdt0 = dsdt0 + beta * (target - s0)
        # dsdt[1] = -s1 + rhop(s1) * (w[2](rho(s2)) + rho(s0) @ w[0].weight)
        dsdt1 = -s1 + rhop(s1) * d1
        # dsdt[2] = -s2 + rhop(s2) * (w[-1](rho(data)) + rho(s1) @ w[-3].weight)
        dsdt2 = -s2 + rhop(s2) * d2

        s0n = s0 + dt * dsdt0
        s1n = s1 + dt * dsdt1
        s2n = s2 + dt * dsdt2
        if not no_clamp:
            s0n = jnp.clip(s0n, 0.0, 1.0)
            s1n = jnp.clip(s1n, 0.0, 1.0)
            s2n = jnp.clip(s2n, 0.0, 1.0)
        return (s0n, s1n, s2n)

    # Full unroll for short loops; partial unroll otherwise (overlaps the VPU
    # epilogue of step t with the MXU pushes of step t+1).
    unroll = True if n_steps <= 8 else 4
    s0, s1, s2 = lax.fori_loop(0, n_steps, body,
                               (s0_in[...], s1_in[...], s2_in[...]),
                               unroll=unroll)

    s0_out[...] = s0
    s1_out[...] = s1
    s2_out[...] = s2

    # TODO(synk): methods 'withgrad'/'nS'/'dSdT' and the cep online weight
    # update (computeGradients / updateWeights) need autograd / weight-update
    # bookkeeping and are not part of this forward kernel.


def ep_forward(data, s_init, weights, biases, *, T, dt, beta=0.0,
               target=None, no_clamp=False):
    """EPcont.forward(..., method='nograd').

    Runs `T` stepper() iterations (the caller passes T for the free phase,
    Kmax for the nudged phase with beta > 0).
    """
    s0, s1, s2 = s_init
    w0, w2, w4 = weights
    b0, b2, b4 = biases
    if target is None:
        target = jnp.zeros_like(s0)

    batch = data.shape[0]
    n0, n1 = w0.shape          # w0: (n0, n1)   (torch nn.Linear convention)
    n2 = w2.shape[1]           # w2: (n1, n2)
    n3 = w4.shape[1]           # w4: (n2, n3)

    f32 = jnp.float32
    bf16 = jnp.bfloat16

    # Pad features to lane multiples (128); pad batch to the batch block.
    n0p, n1p, n2p, n3p = (_round_up(n, 128) for n in (n0, n1, n2, n3))
    bp0 = _round_up(batch, 8)
    bblock = min(bp0, 128)               # per-grid-point batch tile (MXU M)
    bp = _round_up(bp0, bblock)
    n_bblocks = bp // bblock

    s0p = _pad2(s0.astype(f32), bp, n0p)
    s1p = _pad2(s1.astype(f32), bp, n1p)
    s2p = _pad2(s2.astype(f32), bp, n2p)
    datap = _pad2(data.astype(f32), bp, n3p)
    targetp = _pad2(target.astype(f32), bp, n0p)

    w0p = _pad2(w0.astype(f32), n0p, n1p)
    w2p = _pad2(w2.astype(f32), n1p, n2p)
    w4p = _pad2(w4.astype(f32), n2p, n3p)

    # Fused weights (bf16):
    #   w_out = [w0.T | w2]      (n1p, n0p + n2p)  for  rho(s1) @ w_out
    #   w_in  = [[w2.T], [w0]]   (n2p + n0p, n1p)  for  [rho(s2)|rho(s0)] @ w_in
    w_out = jnp.concatenate([w0p.T, w2p], axis=1).astype(bf16)
    w_in = jnp.concatenate([w2p.T, w0p], axis=0).astype(bf16)
    w4tp = w4p.T.astype(bf16)                       # (n3p, n2p) for rho(data)@w4.T

    b0p = jnp.pad(b0.astype(f32), (0, n0p - n0)).reshape(1, n0p)
    b2p = jnp.pad(b2.astype(f32), (0, n1p - n1)).reshape(1, n1p)
    b4p = jnp.pad(b4.astype(f32), (0, n2p - n2)).reshape(1, n2p)

    def bspec(feat):
        return pl.BlockSpec((bblock, feat), lambda i: (i, 0))

    # Weights / biases: whole array, VMEM-resident, no pipelining buffers.
    vmem_full = pl.BlockSpec(memory_space=pltpu.MemorySpace.VMEM)

    out_shapes = (
        jax.ShapeDtypeStruct((bp, n0p), f32),
        jax.ShapeDtypeStruct((bp, n1p), f32),
        jax.ShapeDtypeStruct((bp, n2p), f32),
    )

    kernel = functools.partial(
        _ep_kernel, float(dt), float(beta), int(T), bool(no_clamp), int(n0p))

    s0o, s1o, s2o = pl.pallas_call(
        kernel,
        out_shape=out_shapes,
        grid_spec=pltpu.PrefetchScalarGridSpec(
            num_scalar_prefetch=0,
            grid=(n_bblocks,),
            in_specs=[
                bspec(n0p), bspec(n1p), bspec(n2p),     # s0, s1, s2
                bspec(n0p), bspec(n3p),                 # target, data
                vmem_full, vmem_full, vmem_full,        # w_out, w_in, w4t
                vmem_full, vmem_full, vmem_full,        # b0, b2, b4
            ],
            out_specs=[bspec(n0p), bspec(n1p), bspec(n2p)],
        ),
        input_output_aliases={0: 0, 1: 1, 2: 2},
        compiler_params=pltpu.CompilerParams(
            dimension_semantics=("parallel",),
            vmem_limit_bytes=64 * 1024 * 1024),
    )(s0p, s1p, s2p, targetp, datap, w_out, w_in, w4tp, b0p, b2p, b4p)

    return s0o[:batch, :n0], s1o[:batch, :n1], s2o[:batch, :n2]


def ep_forward_ref(data, s_init, weights, biases, *, T, dt, beta=0.0,
                   target=None, no_clamp=False):
    """Pure-JAX reference mirroring the PyTorch stepper loop (f32, HIGHEST)."""
    s0, s1, s2 = s_init
    w0, w2, w4 = weights
    b0, b2, b4 = biases
    if target is None:
        target = jnp.zeros_like(s0)
    hp = jax.lax.Precision.HIGHEST
    for _ in range(T):
        dsdt0 = -s0 + jnp.dot(rho(s1), w0.T, precision=hp) + b0
        if beta > 0.0:
            dsdt0 = dsdt0 + beta * (target - s0)
        dsdt1 = -s1 + rhop(s1) * (jnp.dot(rho(s2), w2.T, precision=hp) + b2
                                  + jnp.dot(rho(s0), w0, precision=hp))
        dsdt2 = -s2 + rhop(s2) * (jnp.dot(rho(data), w4.T, precision=hp) + b4
                                  + jnp.dot(rho(s1), w2, precision=hp))
        if no_clamp:
            s0 = s0 + dt * dsdt0
            s1 = s1 + dt * dsdt1
            s2 = s2 + dt * dsdt2
        else:
            s0 = jnp.clip(s0 + dt * dsdt0, 0.0, 1.0)
            s1 = jnp.clip(s1 + dt * dsdt1, 0.0, 1.0)
            s2 = jnp.clip(s2 + dt * dsdt2, 0.0, 1.0)
    return s0, s1, s2


if __name__ == "__main__":
    # args-equivalent configuration (small, deterministic)
    size_tab = [8, 16, 32, 64]   # [output, hidden1, hidden2, data] — ns = 3
    T = 6
    Kmax = 4
    dt = 0.2
    beta_nudge = 0.5
    batch = 2

    key = jax.random.PRNGKey(0)
    (k_data, k_s0, k_s1, k_s2, k_tgt,
     kw0, kb0, kw2, kb2, kw4, kb4) = jax.random.split(key, 11)

    data = jax.random.uniform(k_data, (batch, size_tab[3]), jnp.float32)
    # forward() is called with whatever s is passed in; random states exercise
    # rho / rhop / clamp (initHidden would give zeros).
    s_init = (
        jax.random.uniform(k_s0, (batch, size_tab[0]), jnp.float32, -0.5, 1.5),
        jax.random.uniform(k_s1, (batch, size_tab[1]), jnp.float32, -0.5, 1.5),
        jax.random.uniform(k_s2, (batch, size_tab[2]), jnp.float32, -0.5, 1.5),
    )
    target = jax.random.uniform(k_tgt, (batch, size_tab[0]), jnp.float32)

    def linear_init(kw, kb, out_f, in_f):
        bound = 1.0 / jnp.sqrt(in_f)
        w = jax.random.uniform(kw, (out_f, in_f), jnp.float32, -bound, bound)
        b = jax.random.uniform(kb, (out_f,), jnp.float32, -bound, bound)
        return w, b

    w0, b0 = linear_init(kw0, kb0, size_tab[0], size_tab[1])   # w[0]
    w2, b2 = linear_init(kw2, kb2, size_tab[1], size_tab[2])   # w[2]
    w4, b4 = linear_init(kw4, kb4, size_tab[2], size_tab[3])   # w[-1]
    weights = (w0, w2, w4)
    biases = (b0, b2, b4)

    # Kernel dots run at bf16 MXU precision (f32 accumulation); reference is
    # Precision.HIGHEST -> documented tolerance 2e-3.
    RTOL = ATOL = 2e-3

    # ---- free phase (beta = 0, T steps) ----
    out_free = ep_forward(data, s_init, weights, biases, T=T, dt=dt)
    out_free = jax.block_until_ready(out_free)
    ref_free = ep_forward_ref(data, s_init, weights, biases, T=T, dt=dt)
    for o, r in zip(out_free, ref_free):
        assert o.shape == r.shape and o.dtype == r.dtype
        assert jnp.allclose(o, r, rtol=RTOL, atol=ATOL), (o, r)

    # ---- nudged phase (beta > 0, Kmax steps), from the free-phase state ----
    out_nudge = ep_forward(data, out_free, weights, biases,
                           T=Kmax, dt=dt, beta=beta_nudge, target=target)
    out_nudge = jax.block_until_ready(out_nudge)
    ref_nudge = ep_forward_ref(data, out_free, weights, biases,
                               T=Kmax, dt=dt, beta=beta_nudge, target=target)
    for o, r in zip(out_nudge, ref_nudge):
        assert o.shape == r.shape and o.dtype == r.dtype
        assert jnp.allclose(o, r, rtol=RTOL, atol=ATOL), (o, r)

    print("KERNEL_OK")
</pallas_src>

<mosaic_0001>
module attributes {stable_mosaic.version = 11 : i64} {
  func.func @_ep_kernel(%arg0: i32, %arg1: memref<8x128xf32, #tpu.memory_space<vmem>>, %arg2: memref<8x128xf32, #tpu.memory_space<vmem>>, %arg3: memref<8x128xf32, #tpu.memory_space<vmem>>, %arg4: memref<8x128xf32, #tpu.memory_space<vmem>>, %arg5: memref<8x128xf32, #tpu.memory_space<vmem>>, %arg6: memref<128x256xbf16, #tpu.memory_space<vmem>>, %arg7: memref<256x128xbf16, #tpu.memory_space<vmem>>, %arg8: memref<128x128xbf16, #tpu.memory_space<vmem>>, %arg9: memref<1x128xf32, #tpu.memory_space<vmem>>, %arg10: memref<1x128xf32, #tpu.memory_space<vmem>>, %arg11: memref<1x128xf32, #tpu.memory_space<vmem>>, %arg12: memref<8x128xf32, #tpu.memory_space<vmem>>, %arg13: memref<8x128xf32, #tpu.memory_space<vmem>>, %arg14: memref<8x128xf32, #tpu.memory_space<vmem>>) attributes {dimension_semantics = [#tpu.dimension_semantics<parallel>], iteration_bounds = array<i64: 1>, scalar_prefetch = 0 : i64, scratch_operands = 0 : i64, tpu.core_type = #tpu.core_type<tc>, window_params = [{transform_indices = @transform_0, window_bounds = array<i64: 8, 128>}, {transform_indices = @transform_1, window_bounds = array<i64: 8, 128>}, {transform_indices = @transform_2, window_bounds = array<i64: 8, 128>}, {transform_indices = @transform_3, window_bounds = array<i64: 8, 128>}, {transform_indices = @transform_4, window_bounds = array<i64: 8, 128>}, {pipeline_mode = #tpu.pipeline_mode<synchronous>, transform_indices = @transform_5, window_bounds = array<i64: 128, 256>}, {pipeline_mode = #tpu.pipeline_mode<synchronous>, transform_indices = @transform_6, window_bounds = array<i64: 256, 128>}, {pipeline_mode = #tpu.pipeline_mode<synchronous>, transform_indices = @transform_7, window_bounds = array<i64: 128, 128>}, {pipeline_mode = #tpu.pipeline_mode<synchronous>, transform_indices = @transform_8, window_bounds = array<i64: 1, 128>}, {pipeline_mode = #tpu.pipeline_mode<synchronous>, transform_indices = @transform_9, window_bounds = array<i64: 1, 128>}, {pipeline_mode = #tpu.pipeline_mode<synchronous>, transform_indices = @transform_10, window_bounds = array<i64: 1, 128>}, {transform_indices = @transform_11, window_bounds = array<i64: 8, 128>}, {transform_indices = @transform_12, window_bounds = array<i64: 8, 128>}, {transform_indices = @transform_13, window_bounds = array<i64: 8, 128>}]} {
    %c0 = arith.constant 0 : index
    %c0_0 = arith.constant 0 : index
    %0 = vector.load %arg5[%c0, %c0_0] : memref<8x128xf32, #tpu.memory_space<vmem>>, vector<8x128xf32>
    %cst = arith.constant 0.000000e+00 : f32
    %cst_1 = arith.constant 1.000000e+00 : f32
    %1 = vector.broadcast %cst : f32 to vector<8x128xf32>
    %2 = arith.maximumf %1, %0 : vector<8x128xf32>
    %3 = vector.broadcast %cst_1 : f32 to vector<8x128xf32>
    %4 = arith.minimumf %3, %2 : vector<8x128xf32>
    %5 = arith.truncf %4 : vector<8x128xf32> to vector<8x128xbf16>
    %c0_2 = arith.constant 0 : index
    %c0_3 = arith.constant 0 : index
    %6 = vector.load %arg8[%c0_2, %c0_3] : memref<128x128xbf16, #tpu.memory_space<vmem>>, vector<128x128xbf16>
    %cst_4 = arith.constant dense<0.000000e+00> : vector<8x128xf32>
    %7 = tpu.matmul %5, %6, %cst_4 {dimension_numbers = #tpu.dot_dimension_numbers<[1], [0], [0], [1], [0, 0, 1, 1], [], []>} : vector<8x128xbf16>, vector<128x128xbf16>, vector<8x128xf32> -> vector<8x128xf32>
    %c0_5 = arith.constant 0 : index
    %c0_6 = arith.constant 0 : index
    %8 = vector.load %arg11[%c0_5, %c0_6] : memref<1x128xf32, #tpu.memory_space<vmem>>, vector<1x128xf32>
    %9 = vector.broadcast %8 : vector<1x128xf32> to vector<8x128xf32>
    %10 = arith.addf %7, %9 : vector<8x128xf32>
    %c0_7 = arith.constant 0 : index
    %c0_8 = arith.constant 0 : index
    %11 = vector.load %arg9[%c0_7, %c0_8] : memref<1x128xf32, #tpu.memory_space<vmem>>, vector<1x128xf32>
    %12 = vector.shape_cast %11 : vector<1x128xf32> to vector<1x128xf32>
    %13 = vector.broadcast %12 : vector<1x128xf32> to vector<8x128xf32>
    %14 = tpu.concatenate %13, %10 in 1 : vector<8x128xf32>, vector<8x128xf32> -> vector<8x256xf32>
    %c0_9 = arith.constant 0 : index
    %c0_10 = arith.constant 0 : index
    %15 = vector.load %arg10[%c0_9, %c0_10] : memref<1x128xf32, #tpu.memory_space<vmem>>, vector<1x128xf32>
    %16 = vector.shape_cast %15 : vector<1x128xf32> to vector<1x128xf32>
    %17 = vector.broadcast %16 : vector<1x128xf32> to vector<8x128xf32>
    %c0_11 = arith.constant 0 : index
    %c0_12 = arith.constant 0 : index
    %18 = vector.load %arg1[%c0_11, %c0_12] : memref<8x128xf32, #tpu.memory_space<vmem>>, vector<8x128xf32>
    %c0_13 = arith.constant 0 : index
    %c0_14 = arith.constant 0 : index
    %19 = vector.load %arg2[%c0_13, %c0_14] : memref<8x128xf32, #tpu.memory_space<vmem>>, vector<8x128xf32>
    %c0_15 = arith.constant 0 : index
    %c0_16 = arith.constant 0 : index
    %20 = vector.load %arg3[%c0_15, %c0_16] : memref<8x128xf32, #tpu.memory_space<vmem>>, vector<8x128xf32>
    %c0_i32 = arith.constant 0 : i32
    %cst_17 = arith.constant 0.000000e+00 : f32
    %cst_18 = arith.constant 1.000000e+00 : f32
    %21 = vector.broadcast %cst_17 : f32 to vector<8x128xf32>
    %22 = arith.maximumf %21, %19 : vector<8x128xf32>
    %23 = vector.broadcast %cst_18 : f32 to vector<8x128xf32>
    %24 = arith.minimumf %23, %22 : vector<8x128xf32>
    %25 = arith.truncf %24 : vector<8x128xf32> to vector<8x128xbf16>
    %c0_19 = arith.constant 0 : index
    %c0_20 = arith.constant 0 : index
    %26 = vector.load %arg6[%c0_19, %c0_20] : memref<128x256xbf16, #tpu.memory_space<vmem>>, vector<128x256xbf16>
    %cst_21 = arith.constant dense<0.000000e+00> : vector<8x256xf32>
    %27 = tpu.matmul %25, %26, %cst_21 {dimension_numbers = #tpu.dot_dimension_numbers<[1], [0], [0], [1], [0, 0, 1, 1], [], []>} : vector<8x128xbf16>, vector<128x256xbf16>, vector<8x256xf32> -> vector<8x256xf32>
    %28 = arith.addf %27, %14 : vector<8x256xf32>
    %29 = vector.extract_strided_slice %28 {offsets = [0, 0], sizes = [8, 128], strides = [1, 1]} : vector<8x256xf32> to vector<8x128xf32>
    %30 = vector.extract_strided_slice %28 {offsets = [0, 128], sizes = [8, 128], strides = [1, 1]} : vector<8x256xf32> to vector<8x128xf32>
    %cst_22 = arith.constant 0.000000e+00 : f32
    %cst_23 = arith.constant 1.000000e+00 : f32
    %31 = vector.broadcast %cst_22 : f32 to vector<8x128xf32>
    %32 = arith.maximumf %31, %20 : vector<8x128xf32>
    %33 = vector.broadcast %cst_23 : f32 to vector<8x128xf32>
    %34 = arith.minimumf %33, %32 : vector<8x128xf32>
    %cst_24 = arith.constant 0.000000e+00 : f32
    %cst_25 = arith.constant 1.000000e+00 : f32
    %35 = vector.broadcast %cst_24 : f32 to vector<8x128xf32>
    %36 = arith.maximumf %35, %18 : vector<8x128xf32>
    %37 = vector.broadcast %cst_25 : f32 to vector<8x128xf32>
    %38 = arith.minimumf %37, %36 : vector<8x128xf32>
    %39 = tpu.concatenate %34, %38 in 1 : vector<8x128xf32>, vector<8x128xf32> -> vector<8x256xf32>
    %40 = arith.truncf %39 : vector<8x256xf32> to vector<8x256xbf16>
    %c0_26 = arith.constant 0 : index
    %c0_27 = arith.constant 0 : index
    %41 = vector.load %arg7[%c0_26, %c0_27] : memref<256x128xbf16, #tpu.memory_space<vmem>>, vector<256x128xbf16>
    %cst_28 = arith.constant dense<0.000000e+00> : vector<8x128xf32>
    %42 = tpu.matmul %40, %41, %cst_28 {dimension_numbers = #tpu.dot_dimension_numbers<[1], [0], [0], [1], [0, 0, 1, 1], [], []>} : vector<8x256xbf16>, vector<256x128xbf16>, vector<8x128xf32> -> vector<8x128xf32>
    %43 = arith.addf %42, %17 : vector<8x128xf32>
    %cst_29 = arith.constant 0.000000e+00 : f32
    %44 = vector.broadcast %cst_29 : f32 to vector<8x128xf32>
    %45 = arith.subf %44, %18 : vector<8x128xf32>
    %46 = arith.addf %45, %29 : vector<8x128xf32>
    %cst_30 = arith.constant 0.000000e+00 : f32
    %47 = vector.broadcast %cst_30 : f32 to vector<8x128xf32>
    %48 = arith.subf %47, %19 : vector<8x128xf32>
    %cst_31 = arith.constant 0.000000e+00 : f32
    %49 = vector.broadcast %cst_31 : f32 to vector<8x128xf32>
    %50 = arith.cmpf oge, %19, %49 : vector<8x128xf32>
    %cst_32 = arith.constant 1.000000e+00 : f32
    %51 = vector.broadcast %cst_32 : f32 to vector<8x128xf32>
    %52 = arith.cmpf ole, %19, %51 : vector<8x128xf32>
    %53 = arith.andi %50, %52 : vector<8x128xi1>
    %54 = arith.extui %53 : vector<8x128xi1> to vector<8x128xi32>
    %55 = arith.sitofp %54 : vector<8x128xi32> to vector<8x128xf32>
    %56 = arith.mulf %55, %43 : vector<8x128xf32>
    %57 = arith.addf %48, %56 : vector<8x128xf32>
    %cst_33 = arith.constant 0.000000e+00 : f32
    %58 = vector.broadcast %cst_33 : f32 to vector<8x128xf32>
    %59 = arith.subf %58, %20 : vector<8x128xf32>
    %cst_34 = arith.constant 0.000000e+00 : f32
    %60 = vector.broadcast %cst_34 : f32 to vector<8x128xf32>
    %61 = arith.cmpf oge, %20, %60 : vector<8x128xf32>
    %cst_35 = arith.constant 1.000000e+00 : f32
    %62 = vector.broadcast %cst_35 : f32 to vector<8x128xf32>
    %63 = arith.cmpf ole, %20, %62 : vector<8x128xf32>
    %64 = arith.andi %61, %63 : vector<8x128xi1>
    %65 = arith.extui %64 : vector<8x128xi1> to vector<8x128xi32>
    %66 = arith.sitofp %65 : vector<8x128xi32> to vector<8x128xf32>
    %67 = arith.mulf %66, %30 : vector<8x128xf32>
    %68 = arith.addf %59, %67 : vector<8x128xf32>
    %cst_36 = arith.constant 2.000000e-01 : f32
    %69 = vector.broadcast %cst_36 : f32 to vector<8x128xf32>
    %70 = arith.mulf %69, %46 : vector<8x128xf32>
    %71 = arith.addf %18, %70 : vector<8x128xf32>
    %cst_37 = arith.constant 2.000000e-01 : f32
    %72 = vector.broadcast %cst_37 : f32 to vector<8x128xf32>
    %73 = arith.mulf %72, %57 : vector<8x128xf32>
    %74 = arith.addf %19, %73 : vector<8x128xf32>
    %cst_38 = arith.constant 2.000000e-01 : f32
    %75 = vector.broadcast %cst_38 : f32 to vector<8x128xf32>
    %76 = arith.mulf %75, %68 : vector<8x128xf32>
    %77 = arith.addf %20, %76 : vector<8x128xf32>
    %cst_39 = arith.constant 0.000000e+00 : f32
    %cst_40 = arith.constant 1.000000e+00 : f32
    %78 = vector.broadcast %cst_39 : f32 to vector<8x128xf32>
    %79 = arith.maximumf %78, %71 : vector<8x128xf32>
    %80 = vector.broadcast %cst_40 : f32 to vector<8x128xf32>
    %81 = arith.minimumf %80, %79 : vector<8x128xf32>
    %cst_41 = arith.constant 0.000000e+00 : f32
    %cst_42 = arith.constant 1.000000e+00 : f32
    %82 = vector.broadcast %cst_41 : f32 to vector<8x128xf32>
    %83 = arith.maximumf %82, %74 : vector<8x128xf32>
    %84 = vector.broadcast %cst_42 : f32 to vector<8x128xf32>
    %85 = arith.minimumf %84, %83 : vector<8x128xf32>
    %cst_43 = arith.constant 0.000000e+00 : f32
    %cst_44 = arith.constant 1.000000e+00 : f32
    %86 = vector.broadcast %cst_43 : f32 to vector<8x128xf32>
    %87 = arith.maximumf %86, %77 : vector<8x128xf32>
    %88 = vector.broadcast %cst_44 : f32 to vector<8x128xf32>
    %89 = arith.minimumf %88, %87 : vector<8x128xf32>
    %c1_i32 = arith.constant 1 : i32
    %cst_45 = arith.constant 0.000000e+00 : f32
    %cst_46 = arith.constant 1.000000e+00 : f32
    %90 = vector.broadcast %cst_45 : f32 to vector<8x128xf32>
    %91 = arith.maximumf %90, %85 : vector<8x128xf32>
    %92 = vector.broadcast %cst_46 : f32 to vector<8x128xf32>
    %93 = arith.minimumf %92, %91 : vector<8x128xf32>
    %94 = arith.truncf %93 : vector<8x128xf32> to vector<8x128xbf16>
    %c0_47 = arith.constant 0 : index
    %c0_48 = arith.constant 0 : index
    %95 = vector.load %arg6[%c0_47, %c0_48] : memref<128x256xbf16, #tpu.memory_space<vmem>>, vector<128x256xbf16>
    %cst_49 = arith.constant dense<0.000000e+00> : vector<8x256xf32>
    %96 = tpu.matmul %94, %95, %cst_49 {dimension_numbers = #tpu.dot_dimension_numbers<[1], [0], [0], [1], [0, 0, 1, 1], [], []>} : vector<8x128xbf16>, vector<128x256xbf16>, vector<8x256xf32> -> vector<8x256xf32>
    %97 = arith.addf %96, %14 : vector<8x256xf32>
    %98 = vector.extract_strided_slice %97 {offsets = [0, 0], sizes = [8, 128], strides = [1, 1]} : vector<8x256xf32> to vector<8x128xf32>
    %99 = vector.extract_strided_slice %97 {offsets = [0, 128], sizes = [8, 128], strides = [1, 1]} : vector<8x256xf32> to vector<8x128xf32>
    %cst_50 = arith.constant 0.000000e+00 : f32
    %cst_51 = arith.constant 1.000000e+00 : f32
    %100 = vector.broadcast %cst_50 : f32 to vector<8x128xf32>
    %101 = arith.maximumf %100, %89 : vector<8x128xf32>
    %102 = vector.broadcast %cst_51 : f32 to vector<8x128xf32>
    %103 = arith.minimumf %102, %101 : vector<8x128xf32>
    %cst_52 = arith.constant 0.000000e+00 : f32
    %cst_53 = arith.constant 1.000000e+00 : f32
    %104 = vector.broadcast %cst_52 : f32 to vector<8x128xf32>
    %105 = arith.maximumf %104, %81 : vector<8x128xf32>
    %106 = vector.broadcast %cst_53 : f32 to vector<8x128xf32>
    %107 = arith.minimumf %106, %105 : vector<8x128xf32>
    %108 = tpu.concatenate %103, %107 in 1 : vector<8x128xf32>, vector<8x128xf32> -> vector<8x256xf32>
    %109 = arith.truncf %108 : vector<8x256xf32> to vector<8x256xbf16>
    %c0_54 = arith.constant 0 : index
    %c0_55 = arith.constant 0 : index
    %110 = vector.load %arg7[%c0_54, %c0_55] : memref<256x128xbf16, #tpu.memory_space<vmem>>, vector<256x128xbf16>
    %cst_56 = arith.constant dense<0.000000e+00> : vector<8x128xf32>
    %111 = tpu.matmul %109, %110, %cst_56 {dimension_numbers = #tpu.dot_dimension_numbers<[1], [0], [0], [1], [0, 0, 1, 1], [], []>} : vector<8x256xbf16>, vector<256x128xbf16>, vector<8x128xf32> -> vector<8x128xf32>
    %112 = arith.addf %111, %17 : vector<8x128xf32>
    %cst_57 = arith.constant 0.000000e+00 : f32
    %113 = vector.broadcast %cst_57 : f32 to vector<8x128xf32>
    %114 = arith.subf %113, %81 : vector<8x128xf32>
    %115 = arith.addf %114, %98 : vector<8x128xf32>
    %cst_58 = arith.constant 0.000000e+00 : f32
    %116 = vector.broadcast %cst_58 : f32 to vector<8x128xf32>
    %117 = arith.subf %116, %85 : vector<8x128xf32>
    %cst_59 = arith.constant 0.000000e+00 : f32
    %118 = vector.broadcast %cst_59 : f32 to vector<8x128xf32>
    %119 = arith.cmpf oge, %85, %118 : vector<8x128xf32>
    %cst_60 = arith.constant 1.000000e+00 : f32
    %120 = vector.broadcast %cst_60 : f32 to vector<8x128xf32>
    %121 = arith.cmpf ole, %85, %120 : vector<8x128xf32>
    %122 = arith.andi %119, %121 : vector<8x128xi1>
    %123 = arith.extui %122 : vector<8x128xi1> to vector<8x128xi32>
    %124 = arith.sitofp %123 : vector<8x128xi32> to vector<8x128xf32>
    %125 = arith.mulf %124, %112 : vector<8x128xf32>
    %126 = arith.addf %117, %125 : vector<8x128xf32>
    %cst_61 = arith.constant 0.000000e+00 : f32
    %127 = vector.broadcast %cst_61 : f32 to vector<8x128xf32>
    %128 = arith.subf %127, %89 : vector<8x128xf32>
    %cst_62 = arith.constant 0.000000e+00 : f32
    %129 = vector.broadcast %cst_62 : f32 to vector<8x128xf32>
    %130 = arith.cmpf oge, %89, %129 : vector<8x128xf32>
    %cst_63 = arith.constant 1.000000e+00 : f32
    %131 = vector.broadcast %cst_63 : f32 to vector<8x128xf32>
    %132 = arith.cmpf ole, %89, %131 : vector<8x128xf32>
    %133 = arith.andi %130, %132 : vector<8x128xi1>
    %134 = arith.extui %133 : vector<8x128xi1> to vector<8x128xi32>
    %135 = arith.sitofp %134 : vector<8x128xi32> to vector<8x128xf32>
    %136 = arith.mulf %135, %99 : vector<8x128xf32>
    %137 = arith.addf %128, %136 : vector<8x128xf32>
    %cst_64 = arith.constant 2.000000e-01 : f32
    %138 = vector.broadcast %cst_64 : f32 to vector<8x128xf32>
    %139 = arith.mulf %138, %115 : vector<8x128xf32>
    %140 = arith.addf %81, %139 : vector<8x128xf32>
    %cst_65 = arith.constant 2.000000e-01 : f32
    %141 = vector.broadcast %cst_65 : f32 to vector<8x128xf32>
    %142 = arith.mulf %141, %126 : vector<8x128xf32>
    %143 = arith.addf %85, %142 : vector<8x128xf32>
    %cst_66 = arith.constant 2.000000e-01 : f32
    %144 = vector.broadcast %cst_66 : f32 to vector<8x128xf32>
    %145 = arith.mulf %144, %137 : vector<8x128xf32>
    %146 = arith.addf %89, %145 : vector<8x128xf32>
    %cst_67 = arith.constant 0.000000e+00 : f32
    %cst_68 = arith.constant 1.000000e+00 : f32
    %147 = vector.broadcast %cst_67 : f32 to vector<8x128xf32>
    %148 = arith.maximumf %147, %140 : vector<8x128xf32>
    %149 = vector.broadcast %cst_68 : f32 to vector<8x128xf32>
    %150 = arith.minimumf %149, %148 : vector<8x128xf32>
    %cst_69 = arith.constant 0.000000e+00 : f32
    %cst_70 = arith.constant 1.000000e+00 : f32
    %151 = vector.broadcast %cst_69 : f32 to vector<8x128xf32>
    %152 = arith.maximumf %151, %143 : vector<8x128xf32>
    %153 = vector.broadcast %cst_70 : f32 to vector<8x128xf32>
    %154 = arith.minimumf %153, %152 : vector<8x128xf32>
    %cst_71 = arith.constant 0.000000e+00 : f32
    %cst_72 = arith.constant 1.000000e+00 : f32
    %155 = vector.broadcast %cst_71 : f32 to vector<8x128xf32>
    %156 = arith.maximumf %155, %146 : vector<8x128xf32>
    %157 = vector.broadcast %cst_72 : f32 to vector<8x128xf32>
    %158 = arith.minimumf %157, %156 : vector<8x128xf32>
    %c2_i32 = arith.constant 2 : i32
    %cst_73 = arith.constant 0.000000e+00 : f32
    %cst_74 = arith.constant 1.000000e+00 : f32
    %159 = vector.broadcast %cst_73 : f32 to vector<8x128xf32>
    %160 = arith.maximumf %159, %154 : vector<8x128xf32>
    %161 = vector.broadcast %cst_74 : f32 to vector<8x128xf32>
    %162 = arith.minimumf %161, %160 : vector<8x128xf32>
    %163 = arith.truncf %162 : vector<8x128xf32> to vector<8x128xbf16>
    %c0_75 = arith.constant 0 : index
    %c0_76 = arith.constant 0 : index
    %164 = vector.load %arg6[%c0_75, %c0_76] : memref<128x256xbf16, #tpu.memory_space<vmem>>, vector<128x256xbf16>
    %cst_77 = arith.constant dense<0.000000e+00> : vector<8x256xf32>
    %165 = tpu.matmul %163, %164, %cst_77 {dimension_numbers = #tpu.dot_dimension_numbers<[1], [0], [0], [1], [0, 0, 1, 1], [], []>} : vector<8x128xbf16>, vector<128x256xbf16>, vector<8x256xf32> -> vector<8x256xf32>
    %166 = arith.addf %165, %14 : vector<8x256xf32>
    %167 = vector.extract_strided_slice %166 {offsets = [0, 0], sizes = [8, 128], strides = [1, 1]} : vector<8x256xf32> to vector<8x128xf32>
    %168 = vector.extract_strided_slice %166 {offsets = [0, 128], sizes = [8, 128], strides = [1, 1]} : vector<8x256xf32> to vector<8x128xf32>
    %cst_78 = arith.constant 0.000000e+00 : f32
    %cst_79 = arith.constant 1.000000e+00 : f32
    %169 = vector.broadcast %cst_78 : f32 to vector<8x128xf32>
    %170 = arith.maximumf %169, %158 : vector<8x128xf32>
    %171 = vector.broadcast %cst_79 : f32 to vector<8x128xf32>
    %172 = arith.minimumf %171, %170 : vector<8x128xf32>
    %cst_80 = arith.constant 0.000000e+00 : f32
    %cst_81 = arith.constant 1.000000e+00 : f32
    %173 = vector.broadcast %cst_80 : f32 to vector<8x128xf32>
    %174 = arith.maximumf %173, %150 : vector<8x128xf32>
    %175 = vector.broadcast %cst_81 : f32 to vector<8x128xf32>
    %176 = arith.minimumf %175, %174 : vector<8x128xf32>
    %177 = tpu.concatenate %172, %176 in 1 : vector<8x128xf32>, vector<8x128xf32> -> vector<8x256xf32>
    %178 = arith.truncf %177 : vector<8x256xf32> to vector<8x256xbf16>
    %c0_82 = arith.constant 0 : index
    %c0_83 = arith.constant 0 : index
    %179 = vector.load %arg7[%c0_82, %c0_83] : memref<256x128xbf16, #tpu.memory_space<vmem>>, vector<256x128xbf16>
    %cst_84 = arith.constant dense<0.000000e+00> : vector<8x128xf32>
    %180 = tpu.matmul %178, %179, %cst_84 {dimension_numbers = #tpu.dot_dimension_numbers<[1], [0], [0], [1], [0, 0, 1, 1], [], []>} : vector<8x256xbf16>, vector<256x128xbf16>, vector<8x128xf32> -> vector<8x128xf32>
    %181 = arith.addf %180, %17 : vector<8x128xf32>
    %cst_85 = arith.constant 0.000000e+00 : f32
    %182 = vector.broadcast %cst_85 : f32 to vector<8x128xf32>
    %183 = arith.subf %182, %150 : vector<8x128xf32>
    %184 = arith.addf %183, %167 : vector<8x128xf32>
    %cst_86 = arith.constant 0.000000e+00 : f32
    %185 = vector.broadcast %cst_86 : f32 to vector<8x128xf32>
    %186 = arith.subf %185, %154 : vector<8x128xf32>
    %cst_87 = arith.constant 0.000000e+00 : f32
    %187 = vector.broadcast %cst_87 : f32 to vector<8x128xf32>
    %188 = arith.cmpf oge, %154, %187 : vector<8x128xf32>
    %cst_88 = arith.constant 1.000000e+00 : f32
    %189 = vector.broadcast %cst_88 : f32 to vector<8x128xf32>
    %190 = arith.cmpf ole, %154, %189 : vector<8x128xf32>
    %191 = arith.andi %188, %190 : vector<8x128xi1>
    %192 = arith.extui %191 : vector<8x128xi1> to vector<8x128xi32>
    %193 = arith.sitofp %192 : vector<8x128xi32> to vector<8x128xf32>
    %194 = arith.mulf %193, %181 : vector<8x128xf32>
    %195 = arith.addf %186, %194 : vector<8x128xf32>
    %cst_89 = arith.constant 0.000000e+00 : f32
    %196 = vector.broadcast %cst_89 : f32 to vector<8x128xf32>
    %197 = arith.subf %196, %158 : vector<8x128xf32>
    %cst_90 = arith.constant 0.000000e+00 : f32
    %198 = vector.broadcast %cst_90 : f32 to vector<8x128xf32>
    %199 = arith.cmpf oge, %158, %198 : vector<8x128xf32>
    %cst_91 = arith.constant 1.000000e+00 : f32
    %200 = vector.broadcast %cst_91 : f32 to vector<8x128xf32>
    %201 = arith.cmpf ole, %158, %200 : vector<8x128xf32>
    %202 = arith.andi %199, %201 : vector<8x128xi1>
    %203 = arith.extui %202 : vector<8x128xi1> to vector<8x128xi32>
    %204 = arith.sitofp %203 : vector<8x128xi32> to vector<8x128xf32>
    %205 = arith.mulf %204, %168 : vector<8x128xf32>
    %206 = arith.addf %197, %205 : vector<8x128xf32>
    %cst_92 = arith.constant 2.000000e-01 : f32
    %207 = vector.broadcast %cst_92 : f32 to vector<8x128xf32>
    %208 = arith.mulf %207, %184 : vector<8x128xf32>
    %209 = arith.addf %150, %208 : vector<8x128xf32>
    %cst_93 = arith.constant 2.000000e-01 : f32
    %210 = vector.broadcast %cst_93 : f32 to vector<8x128xf32>
    %211 = arith.mulf %210, %195 : vector<8x128xf32>
    %212 = arith.addf %154, %211 : vector<8x128xf32>
    %cst_94 = arith.constant 2.000000e-01 : f32
    %213 = vector.broadcast %cst_94 : f32 to vector<8x128xf32>
    %214 = arith.mulf %213, %206 : vector<8x128xf32>
    %215 = arith.addf %158, %214 : vector<8x128xf32>
    %cst_95 = arith.constant 0.000000e+00 : f32
    %cst_96 = arith.constant 1.000000e+00 : f32
    %216 = vector.broadcast %cst_95 : f32 to vector<8x128xf32>
    %217 = arith.maximumf %216, %209 : vector<8x128xf32>
    %218 = vector.broadcast %cst_96 : f32 to vector<8x128xf32>
    %219 = arith.minimumf %218, %217 : vector<8x128xf32>
    %cst_97 = arith.constant 0.000000e+00 : f32
    %cst_98 = arith.constant 1.000000e+00 : f32
    %220 = vector.broadcast %cst_97 : f32 to vector<8x128xf32>
    %221 = arith.maximumf %220, %212 : vector<8x128xf32>
    %222 = vector.broadcast %cst_98 : f32 to vector<8x128xf32>
    %223 = arith.minimumf %222, %221 : vector<8x128xf32>
    %cst_99 = arith.constant 0.000000e+00 : f32
    %cst_100 = arith.constant 1.000000e+00 : f32
    %224 = vector.broadcast %cst_99 : f32 to vector<8x128xf32>
    %225 = arith.maximumf %224, %215 : vector<8x128xf32>
    %226 = vector.broadcast %cst_100 : f32 to vector<8x128xf32>
    %227 = arith.minimumf %226, %225 : vector<8x128xf32>
    %c3_i32 = arith.constant 3 : i32
    %cst_101 = arith.constant 0.000000e+00 : f32
    %cst_102 = arith.constant 1.000000e+00 : f32
    %228 = vector.broadcast %cst_101 : f32 to vector<8x128xf32>
    %229 = arith.maximumf %228, %223 : vector<8x128xf32>
    %230 = vector.broadcast %cst_102 : f32 to vector<8x128xf32>
    %231 = arith.minimumf %230, %229 : vector<8x128xf32>
    %232 = arith.truncf %231 : vector<8x128xf32> to vector<8x128xbf16>
    %c0_103 = arith.constant 0 : index
    %c0_104 = arith.constant 0 : index
    %233 = vector.load %arg6[%c0_103, %c0_104] : memref<128x256xbf16, #tpu.memory_space<vmem>>, vector<128x256xbf16>
    %cst_105 = arith.constant dense<0.000000e+00> : vector<8x256xf32>
    %234 = tpu.matmul %232, %233, %cst_105 {dimension_numbers = #tpu.dot_dimension_numbers<[1], [0], [0], [1], [0, 0, 1, 1], [], []>} : vector<8x128xbf16>, vector<128x256xbf16>, vector<8x256xf32> -> vector<8x256xf32>
    %235 = arith.addf %234, %14 : vector<8x256xf32>
    %236 = vector.extract_strided_slice %235 {offsets = [0, 0], sizes = [8, 128], strides = [1, 1]} : vector<8x256xf32> to vector<8x128xf32>
    %237 = vector.extract_strided_slice %235 {offsets = [0, 128], sizes = [8, 128], strides = [1, 1]} : vector<8x256xf32> to vector<8x128xf32>
    %cst_106 = arith.constant 0.000000e+00 : f32
    %cst_107 = arith.constant 1.000000e+00 : f32
    %238 = vector.broadcast %cst_106 : f32 to vector<8x128xf32>
    %239 = arith.maximumf %238, %227 : vector<8x128xf32>
    %240 = vector.broadcast %cst_107 : f32 to vector<8x128xf32>
    %241 = arith.minimumf %240, %239 : vector<8x128xf32>
    %cst_108 = arith.constant 0.000000e+00 : f32
    %cst_109 = arith.constant 1.000000e+00 : f32
    %242 = vector.broadcast %cst_108 : f32 to vector<8x128xf32>
    %243 = arith.maximumf %242, %219 : vector<8x128xf32>
    %244 = vector.broadcast %cst_109 : f32 to vector<8x128xf32>
    %245 = arith.minimumf %244, %243 : vector<8x128xf32>
    %246 = tpu.concatenate %241, %245 in 1 : vector<8x128xf32>, vector<8x128xf32> -> vector<8x256xf32>
    %247 = arith.truncf %246 : vector<8x256xf32> to vector<8x256xbf16>
    %c0_110 = arith.constant 0 : index
    %c0_111 = arith.constant 0 : index
    %248 = vector.load %arg7[%c0_110, %c0_111] : memref<256x128xbf16, #tpu.memory_space<vmem>>, vector<256x128xbf16>
    %cst_112 = arith.constant dense<0.000000e+00> : vector<8x128xf32>
    %249 = tpu.matmul %247, %248, %cst_112 {dimension_numbers = #tpu.dot_dimension_numbers<[1], [0], [0], [1], [0, 0, 1, 1], [], []>} : vector<8x256xbf16>, vector<256x128xbf16>, vector<8x128xf32> -> vector<8x128xf32>
    %250 = arith.addf %249, %17 : vector<8x128xf32>
    %cst_113 = arith.constant 0.000000e+00 : f32
    %251 = vector.broadcast %cst_113 : f32 to vector<8x128xf32>
    %252 = arith.subf %251, %219 : vector<8x128xf32>
    %253 = arith.addf %252, %236 : vector<8x128xf32>
    %cst_114 = arith.constant 0.000000e+00 : f32
    %254 = vector.broadcast %cst_114 : f32 to vector<8x128xf32>
    %255 = arith.subf %254, %223 : vector<8x128xf32>
    %cst_115 = arith.constant 0.000000e+00 : f32
    %256 = vector.broadcast %cst_115 : f32 to vector<8x128xf32>
    %257 = arith.cmpf oge, %223, %256 : vector<8x128xf32>
    %cst_116 = arith.constant 1.000000e+00 : f32
    %258 = vector.broadcast %cst_116 : f32 to vector<8x128xf32>
    %259 = arith.cmpf ole, %223, %258 : vector<8x128xf32>
    %260 = arith.andi %257, %259 : vector<8x128xi1>
    %261 = arith.extui %260 : vector<8x128xi1> to vector<8x128xi32>
    %262 = arith.sitofp %261 : vector<8x128xi32> to vector<8x128xf32>
    %263 = arith.mulf %262, %250 : vector<8x128xf32>
    %264 = arith.addf %255, %263 : vector<8x128xf32>
    %cst_117 = arith.constant 0.000000e+00 : f32
    %265 = vector.broadcast %cst_117 : f32 to vector<8x128xf32>
    %266 = arith.subf %265, %227 : vector<8x128xf32>
    %cst_118 = arith.constant 0.000000e+00 : f32
    %267 = vector.broadcast %cst_118 : f32 to vector<8x128xf32>
    %268 = arith.cmpf oge, %227, %267 : vector<8x128xf32>
    %cst_119 = arith.constant 1.000000e+00 : f32
    %269 = vector.broadcast %cst_119 : f32 to vector<8x128xf32>
    %270 = arith.cmpf ole, %227, %269 : vector<8x128xf32>
    %271 = arith.andi %268, %270 : vector<8x128xi1>
    %272 = arith.extui %271 : vector<8x128xi1> to vector<8x128xi32>
    %273 = arith.sitofp %272 : vector<8x128xi32> to vector<8x128xf32>
    %274 = arith.mulf %273, %237 : vector<8x128xf32>
    %275 = arith.addf %266, %274 : vector<8x128xf32>
    %cst_120 = arith.constant 2.000000e-01 : f32
    %276 = vector.broadcast %cst_120 : f32 to vector<8x128xf32>
    %277 = arith.mulf %276, %253 : vector<8x128xf32>
    %278 = arith.addf %219, %277 : vector<8x128xf32>
    %cst_121 = arith.constant 2.000000e-01 : f32
    %279 = vector.broadcast %cst_121 : f32 to vector<8x128xf32>
    %280 = arith.mulf %279, %264 : vector<8x128xf32>
    %281 = arith.addf %223, %280 : vector<8x128xf32>
    %cst_122 = arith.constant 2.000000e-01 : f32
    %282 = vector.broadcast %cst_122 : f32 to vector<8x128xf32>
    %283 = arith.mulf %282, %275 : vector<8x128xf32>
    %284 = arith.addf %227, %283 : vector<8x128xf32>
    %cst_123 = arith.constant 0.000000e+00 : f32
    %cst_124 = arith.constant 1.000000e+00 : f32
    %285 = vector.broadcast %cst_123 : f32 to vector<8x128xf32>
    %286 = arith.maximumf %285, %278 : vector<8x128xf32>
    %287 = vector.broadcast %cst_124 : f32 to vector<8x128xf32>
    %288 = arith.minimumf %287, %286 : vector<8x128xf32>
    %cst_125 = arith.constant 0.000000e+00 : f32
    %cst_126 = arith.constant 1.000000e+00 : f32
    %289 = vector.broadcast %cst_125 : f32 to vector<8x128xf32>
    %290 = arith.maximumf %289, %281 : vector<8x128xf32>
    %291 = vector.broadcast %cst_126 : f32 to vector<8x128xf32>
    %292 = arith.minimumf %291, %290 : vector<8x128xf32>
    %cst_127 = arith.constant 0.000000e+00 : f32
    %cst_128 = arith.constant 1.000000e+00 : f32
    %293 = vector.broadcast %cst_127 : f32 to vector<8x128xf32>
    %294 = arith.maximumf %293, %284 : vector<8x128xf32>
    %295 = vector.broadcast %cst_128 : f32 to vector<8x128xf32>
    %296 = arith.minimumf %295, %294 : vector<8x128xf32>
    %c4_i32 = arith.constant 4 : i32
    %cst_129 = arith.constant 0.000000e+00 : f32
    %cst_130 = arith.constant 1.000000e+00 : f32
    %297 = vector.broadcast %cst_129 : f32 to vector<8x128xf32>
    %298 = arith.maximumf %297, %292 : vector<8x128xf32>
    %299 = vector.broadcast %cst_130 : f32 to vector<8x128xf32>
    %300 = arith.minimumf %299, %298 : vector<8x128xf32>
    %301 = arith.truncf %300 : vector<8x128xf32> to vector<8x128xbf16>
    %c0_131 = arith.constant 0 : index
    %c0_132 = arith.constant 0 : index
    %302 = vector.load %arg6[%c0_131, %c0_132] : memref<128x256xbf16, #tpu.memory_space<vmem>>, vector<128x256xbf16>
    %cst_133 = arith.constant dense<0.000000e+00> : vector<8x256xf32>
    %303 = tpu.matmul %301, %302, %cst_133 {dimension_numbers = #tpu.dot_dimension_numbers<[1], [0], [0], [1], [0, 0, 1, 1], [], []>} : vector<8x128xbf16>, vector<128x256xbf16>, vector<8x256xf32> -> vector<8x256xf32>
    %304 = arith.addf %303, %14 : vector<8x256xf32>
    %305 = vector.extract_strided_slice %304 {offsets = [0, 0], sizes = [8, 128], strides = [1, 1]} : vector<8x256xf32> to vector<8x128xf32>
    %306 = vector.extract_strided_slice %304 {offsets = [0, 128], sizes = [8, 128], strides = [1, 1]} : vector<8x256xf32> to vector<8x128xf32>
    %cst_134 = arith.constant 0.000000e+00 : f32
    %cst_135 = arith.constant 1.000000e+00 : f32
    %307 = vector.broadcast %cst_134 : f32 to vector<8x128xf32>
    %308 = arith.maximumf %307, %296 : vector<8x128xf32>
    %309 = vector.broadcast %cst_135 : f32 to vector<8x128xf32>
    %310 = arith.minimumf %309, %308 : vector<8x128xf32>
    %cst_136 = arith.constant 0.000000e+00 : f32
    %cst_137 = arith.constant 1.000000e+00 : f32
    %311 = vector.broadcast %cst_136 : f32 to vector<8x128xf32>
    %312 = arith.maximumf %311, %288 : vector<8x128xf32>
    %313 = vector.broadcast %cst_137 : f32 to vector<8x128xf32>
    %314 = arith.minimumf %313, %312 : vector<8x128xf32>
    %315 = tpu.concatenate %310, %314 in 1 : vector<8x128xf32>, vector<8x128xf32> -> vector<8x256xf32>
    %316 = arith.truncf %315 : vector<8x256xf32> to vector<8x256xbf16>
    %c0_138 = arith.constant 0 : index
    %c0_139 = arith.constant 0 : index
    %317 = vector.load %arg7[%c0_138, %c0_139] : memref<256x128xbf16, #tpu.memory_space<vmem>>, vector<256x128xbf16>
    %cst_140 = arith.constant dense<0.000000e+00> : vector<8x128xf32>
    %318 = tpu.matmul %316, %317, %cst_140 {dimension_numbers = #tpu.dot_dimension_numbers<[1], [0], [0], [1], [0, 0, 1, 1], [], []>} : vector<8x256xbf16>, vector<256x128xbf16>, vector<8x128xf32> -> vector<8x128xf32>
    %319 = arith.addf %318, %17 : vector<8x128xf32>
    %cst_141 = arith.constant 0.000000e+00 : f32
    %320 = vector.broadcast %cst_141 : f32 to vector<8x128xf32>
    %321 = arith.subf %320, %288 : vector<8x128xf32>
    %322 = arith.addf %321, %305 : vector<8x128xf32>
    %cst_142 = arith.constant 0.000000e+00 : f32
    %323 = vector.broadcast %cst_142 : f32 to vector<8x128xf32>
    %324 = arith.subf %323, %292 : vector<8x128xf32>
    %cst_143 = arith.constant 0.000000e+00 : f32
    %325 = vector.broadcast %cst_143 : f32 to vector<8x128xf32>
    %326 = arith.cmpf oge, %292, %325 : vector<8x128xf32>
    %cst_144 = arith.constant 1.000000e+00 : f32
    %327 = vector.broadcast %cst_144 : f32 to vector<8x128xf32>
    %328 = arith.cmpf ole, %292, %327 : vector<8x128xf32>
    %329 = arith.andi %326, %328 : vector<8x128xi1>
    %330 = arith.extui %329 : vector<8x128xi1> to vector<8x128xi32>
    %331 = arith.sitofp %330 : vector<8x128xi32> to vector<8x128xf32>
    %332 = arith.mulf %331, %319 : vector<8x128xf32>
    %333 = arith.addf %324, %332 : vector<8x128xf32>
    %cst_145 = arith.constant 0.000000e+00 : f32
    %334 = vector.broadcast %cst_145 : f32 to vector<8x128xf32>
    %335 = arith.subf %334, %296 : vector<8x128xf32>
    %cst_146 = arith.constant 0.000000e+00 : f32
    %336 = vector.broadcast %cst_146 : f32 to vector<8x128xf32>
    %337 = arith.cmpf oge, %296, %336 : vector<8x128xf32>
    %cst_147 = arith.constant 1.000000e+00 : f32
    %338 = vector.broadcast %cst_147 : f32 to vector<8x128xf32>
    %339 = arith.cmpf ole, %296, %338 : vector<8x128xf32>
    %340 = arith.andi %337, %339 : vector<8x128xi1>
    %341 = arith.extui %340 : vector<8x128xi1> to vector<8x128xi32>
    %342 = arith.sitofp %341 : vector<8x128xi32> to vector<8x128xf32>
    %343 = arith.mulf %342, %306 : vector<8x128xf32>
    %344 = arith.addf %335, %343 : vector<8x128xf32>
    %cst_148 = arith.constant 2.000000e-01 : f32
    %345 = vector.broadcast %cst_148 : f32 to vector<8x128xf32>
    %346 = arith.mulf %345, %322 : vector<8x128xf32>
    %347 = arith.addf %288, %346 : vector<8x128xf32>
    %cst_149 = arith.constant 2.000000e-01 : f32
    %348 = vector.broadcast %cst_149 : f32 to vector<8x128xf32>
    %349 = arith.mulf %348, %333 : vector<8x128xf32>
    %350 = arith.addf %292, %349 : vector<8x128xf32>
    %cst_150 = arith.constant 2.000000e-01 : f32
    %351 = vector.broadcast %cst_150 : f32 to vector<8x128xf32>
    %352 = arith.mulf %351, %344 : vector<8x128xf32>
    %353 = arith.addf %296, %352 : vector<8x128xf32>
    %cst_151 = arith.constant 0.000000e+00 : f32
    %cst_152 = arith.constant 1.000000e+00 : f32
    %354 = vector.broadcast %cst_151 : f32 to vector<8x128xf32>
    %355 = arith.maximumf %354, %347 : vector<8x128xf32>
    %356 = vector.broadcast %cst_152 : f32 to vector<8x128xf32>
    %357 = arith.minimumf %356, %355 : vector<8x128xf32>
    %cst_153 = arith.constant 0.000000e+00 : f32
    %cst_154 = arith.constant 1.000000e+00 : f32
    %358 = vector.broadcast %cst_153 : f32 to vector<8x128xf32>
    %359 = arith.maximumf %358, %350 : vector<8x128xf32>
    %360 = vector.broadcast %cst_154 : f32 to vector<8x128xf32>
    %361 = arith.minimumf %360, %359 : vector<8x128xf32>
    %cst_155 = arith.constant 0.000000e+00 : f32
    %cst_156 = arith.constant 1.000000e+00 : f32
    %362 = vector.broadcast %cst_155 : f32 to vector<8x128xf32>
    %363 = arith.maximumf %362, %353 : vector<8x128xf32>
    %364 = vector.broadcast %cst_156 : f32 to vector<8x128xf32>
    %365 = arith.minimumf %364, %363 : vector<8x128xf32>
    %c5_i32 = arith.constant 5 : i32
    %cst_157 = arith.constant 0.000000e+00 : f32
    %cst_158 = arith.constant 1.000000e+00 : f32
    %366 = vector.broadcast %cst_157 : f32 to vector<8x128xf32>
    %367 = arith.maximumf %366, %361 : vector<8x128xf32>
    %368 = vector.broadcast %cst_158 : f32 to vector<8x128xf32>
    %369 = arith.minimumf %368, %367 : vector<8x128xf32>
    %370 = arith.truncf %369 : vector<8x128xf32> to vector<8x128xbf16>
    %c0_159 = arith.constant 0 : index
    %c0_160 = arith.constant 0 : index
    %371 = vector.load %arg6[%c0_159, %c0_160] : memref<128x256xbf16, #tpu.memory_space<vmem>>, vector<128x256xbf16>
    %cst_161 = arith.constant dense<0.000000e+00> : vector<8x256xf32>
    %372 = tpu.matmul %370, %371, %cst_161 {dimension_numbers = #tpu.dot_dimension_numbers<[1], [0], [0], [1], [0, 0, 1, 1], [], []>} : vector<8x128xbf16>, vector<128x256xbf16>, vector<8x256xf32> -> vector<8x256xf32>
    %373 = arith.addf %372, %14 : vector<8x256xf32>
    %374 = vector.extract_strided_slice %373 {offsets = [0, 0], sizes = [8, 128], strides = [1, 1]} : vector<8x256xf32> to vector<8x128xf32>
    %375 = vector.extract_strided_slice %373 {offsets = [0, 128], sizes = [8, 128], strides = [1, 1]} : vector<8x256xf32> to vector<8x128xf32>
    %cst_162 = arith.constant 0.000000e+00 : f32
    %cst_163 = arith.constant 1.000000e+00 : f32
    %376 = vector.broadcast %cst_162 : f32 to vector<8x128xf32>
    %377 = arith.maximumf %376, %365 : vector<8x128xf32>
    %378 = vector.broadcast %cst_163 : f32 to vector<8x128xf32>
    %379 = arith.minimumf %378, %377 : vector<8x128xf32>
    %cst_164 = arith.constant 0.000000e+00 : f32
    %cst_165 = arith.constant 1.000000e+00 : f32
    %380 = vector.broadcast %cst_164 : f32 to vector<8x128xf32>
    %381 = arith.maximumf %380, %357 : vector<8x128xf32>
    %382 = vector.broadcast %cst_165 : f32 to vector<8x128xf32>
    %383 = arith.minimumf %382, %381 : vector<8x128xf32>
    %384 = tpu.concatenate %379, %383 in 1 : vector<8x128xf32>, vector<8x128xf32> -> vector<8x256xf32>
    %385 = arith.truncf %384 : vector<8x256xf32> to vector<8x256xbf16>
    %c0_166 = arith.constant 0 : index
    %c0_167 = arith.constant 0 : index
    %386 = vector.load %arg7[%c0_166, %c0_167] : memref<256x128xbf16, #tpu.memory_space<vmem>>, vector<256x128xbf16>
    %cst_168 = arith.constant dense<0.000000e+00> : vector<8x128xf32>
    %387 = tpu.matmul %385, %386, %cst_168 {dimension_numbers = #tpu.dot_dimension_numbers<[1], [0], [0], [1], [0, 0, 1, 1], [], []>} : vector<8x256xbf16>, vector<256x128xbf16>, vector<8x128xf32> -> vector<8x128xf32>
    %388 = arith.addf %387, %17 : vector<8x128xf32>
    %cst_169 = arith.constant 0.000000e+00 : f32
    %389 = vector.broadcast %cst_169 : f32 to vector<8x128xf32>
    %390 = arith.subf %389, %357 : vector<8x128xf32>
    %391 = arith.addf %390, %374 : vector<8x128xf32>
    %cst_170 = arith.constant 0.000000e+00 : f32
    %392 = vector.broadcast %cst_170 : f32 to vector<8x128xf32>
    %393 = arith.subf %392, %361 : vector<8x128xf32>
    %cst_171 = arith.constant 0.000000e+00 : f32
    %394 = vector.broadcast %cst_171 : f32 to vector<8x128xf32>
    %395 = arith.cmpf oge, %361, %394 : vector<8x128xf32>
    %cst_172 = arith.constant 1.000000e+00 : f32
    %396 = vector.broadcast %cst_172 : f32 to vector<8x128xf32>
    %397 = arith.cmpf ole, %361, %396 : vector<8x128xf32>
    %398 = arith.andi %395, %397 : vector<8x128xi1>
    %399 = arith.extui %398 : vector<8x128xi1> to vector<8x128xi32>
    %400 = arith.sitofp %399 : vector<8x128xi32> to vector<8x128xf32>
    %401 = arith.mulf %400, %388 : vector<8x128xf32>
    %402 = arith.addf %393, %401 : vector<8x128xf32>
    %cst_173 = arith.constant 0.000000e+00 : f32
    %403 = vector.broadcast %cst_173 : f32 to vector<8x128xf32>
    %404 = arith.subf %403, %365 : vector<8x128xf32>
    %cst_174 = arith.constant 0.000000e+00 : f32
    %405 = vector.broadcast %cst_174 : f32 to vector<8x128xf32>
    %406 = arith.cmpf oge, %365, %405 : vector<8x128xf32>
    %cst_175 = arith.constant 1.000000e+00 : f32
    %407 = vector.broadcast %cst_175 : f32 to vector<8x128xf32>
    %408 = arith.cmpf ole, %365, %407 : vector<8x128xf32>
    %409 = arith.andi %406, %408 : vector<8x128xi1>
    %410 = arith.extui %409 : vector<8x128xi1> to vector<8x128xi32>
    %411 = arith.sitofp %410 : vector<8x128xi32> to vector<8x128xf32>
    %412 = arith.mulf %411, %375 : vector<8x128xf32>
    %413 = arith.addf %404, %412 : vector<8x128xf32>
    %cst_176 = arith.constant 2.000000e-01 : f32
    %414 = vector.broadcast %cst_176 : f32 to vector<8x128xf32>
    %415 = arith.mulf %414, %391 : vector<8x128xf32>
    %416 = arith.addf %357, %415 : vector<8x128xf32>
    %cst_177 = arith.constant 2.000000e-01 : f32
    %417 = vector.broadcast %cst_177 : f32 to vector<8x128xf32>
    %418 = arith.mulf %417, %402 : vector<8x128xf32>
    %419 = arith.addf %361, %418 : vector<8x128xf32>
    %cst_178 = arith.constant 2.000000e-01 : f32
    %420 = vector.broadcast %cst_178 : f32 to vector<8x128xf32>
    %421 = arith.mulf %420, %413 : vector<8x128xf32>
    %422 = arith.addf %365, %421 : vector<8x128xf32>
    %cst_179 = arith.constant 0.000000e+00 : f32
    %cst_180 = arith.constant 1.000000e+00 : f32
    %423 = vector.broadcast %cst_179 : f32 to vector<8x128xf32>
    %424 = arith.maximumf %423, %416 : vector<8x128xf32>
    %425 = vector.broadcast %cst_180 : f32 to vector<8x128xf32>
    %426 = arith.minimumf %425, %424 : vector<8x128xf32>
    %cst_181 = arith.constant 0.000000e+00 : f32
    %cst_182 = arith.constant 1.000000e+00 : f32
    %427 = vector.broadcast %cst_181 : f32 to vector<8x128xf32>
    %428 = arith.maximumf %427, %419 : vector<8x128xf32>
    %429 = vector.broadcast %cst_182 : f32 to vector<8x128xf32>
    %430 = arith.minimumf %429, %428 : vector<8x128xf32>
    %cst_183 = arith.constant 0.000000e+00 : f32
    %cst_184 = arith.constant 1.000000e+00 : f32
    %431 = vector.broadcast %cst_183 : f32 to vector<8x128xf32>
    %432 = arith.maximumf %431, %422 : vector<8x128xf32>
    %433 = vector.broadcast %cst_184 : f32 to vector<8x128xf32>
    %434 = arith.minimumf %433, %432 : vector<8x128xf32>
    %c0_185 = arith.constant 0 : index
    %c0_186 = arith.constant 0 : index
    %435 = vector.load %arg12[%c0_185, %c0_186] : memref<8x128xf32, #tpu.memory_space<vmem>>, vector<8x128xf32>
    tpu.vector_store %arg12[%c0_185, %c0_186], %426 {strides = array<i32>} : memref<8x128xf32, #tpu.memory_space<vmem>>, vector<8x128xf32>,
    %c0_187 = arith.constant 0 : index
    %c0_188 = arith.constant 0 : index
    %436 = vector.load %arg13[%c0_187, %c0_188] : memref<8x128xf32, #tpu.memory_space<vmem>>, vector<8x128xf32>
    tpu.vector_store %arg13[%c0_187, %c0_188], %430 {strides = array<i32>} : memref<8x128xf32, #tpu.memory_space<vmem>>, vector<8x128xf32>,
    %c0_189 = arith.constant 0 : index
    %c0_190 = arith.constant 0 : index
    %437 = vector.load %arg14[%c0_189, %c0_190] : memref<8x128xf32, #tpu.memory_space<vmem>>, vector<8x128xf32>
    tpu.vector_store %arg14[%c0_189, %c0_190], %434 {strides = array<i32>} : memref<8x128xf32, #tpu.memory_space<vmem>>, vector<8x128xf32>,
    return
  }
  func.func @transform_0(%arg0: i32) -> (i32, i32) {
    %c0_i32 = arith.constant 0 : i32
    %c0_i32_0 = arith.constant 0 : i32
    return %arg0, %c0_i32 : i32, i32
  }
  func.func @transform_1(%arg0: i32) -> (i32, i32) {
    %c0_i32 = arith.constant 0 : i32
    %c0_i32_0 = arith.constant 0 : i32
    return %arg0, %c0_i32 : i32, i32
  }
  func.func @transform_2(%arg0: i32) -> (i32, i32) {
    %c0_i32 = arith.constant 0 : i32
    %c0_i32_0 = arith.constant 0 : i32
    return %arg0, %c0_i32 : i32, i32
  }
  func.func @transform_3(%arg0: i32) -> (i32, i32) {
    %c0_i32 = arith.constant 0 : i32
    %c0_i32_0 = arith.constant 0 : i32
    return %arg0, %c0_i32 : i32, i32
  }
  func.func @transform_4(%arg0: i32) -> (i32, i32) {
    %c0_i32 = arith.constant 0 : i32
    %c0_i32_0 = arith.constant 0 : i32
    return %arg0, %c0_i32 : i32, i32
  }
  func.func @transform_5(%arg0: i32) -> (i32, i32) {
    %c0_i32 = arith.constant 0 : i32
    %c0_i32_0 = arith.constant 0 : i32
    %c0_i32_1 = arith.constant 0 : i32
    return %c0_i32, %c0_i32_0 : i32, i32
  }
  func.func @transform_6(%arg0: i32) -> (i32, i32) {
    %c0_i32 = arith.constant 0 : i32
    %c0_i32_0 = arith.constant 0 : i32
    %c0_i32_1 = arith.constant 0 : i32
    return %c0_i32, %c0_i32_0 : i32, i32
  }
  func.func @transform_7(%arg0: i32) -> (i32, i32) {
    %c0_i32 = arith.constant 0 : i32
    %c0_i32_0 = arith.constant 0 : i32
    %c0_i32_1 = arith.constant 0 : i32
    return %c0_i32, %c0_i32_0 : i32, i32
  }
  func.func @transform_8(%arg0: i32) -> (i32, i32) {
    %c0_i32 = arith.constant 0 : i32
    %c0_i32_0 = arith.constant 0 : i32
    %c0_i32_1 = arith.constant 0 : i32
    return %c0_i32, %c0_i32_0 : i32, i32
  }
  func.func @transform_9(%arg0: i32) -> (i32, i32) {
    %c0_i32 = arith.constant 0 : i32
    %c0_i32_0 = arith.constant 0 : i32
    %c0_i32_1 = arith.constant 0 : i32
    return %c0_i32, %c0_i32_0 : i32, i32
  }
  func.func @transform_10(%arg0: i32) -> (i32, i32) {
    %c0_i32 = arith.constant 0 : i32
    %c0_i32_0 = arith.constant 0 : i32
    %c0_i32_1 = arith.constant 0 : i32
    return %c0_i32, %c0_i32_0 : i32, i32
  }
  func.func @transform_11(%arg0: i32) -> (i32, i32) {
    %c0_i32 = arith.constant 0 : i32
    %c0_i32_0 = arith.constant 0 : i32
    return %arg0, %c0_i32 : i32, i32
  }
  func.func @transform_12(%arg0: i32) -> (i32, i32) {
    %c0_i32 = arith.constant 0 : i32
    %c0_i32_0 = arith.constant 0 : i32
    return %arg0, %c0_i32 : i32, i32
  }
  func.func @transform_13(%arg0: i32) -> (i32, i32) {
    %c0_i32 = arith.constant 0 : i32
    %c0_i32_0 = arith.constant 0 : i32
    return %arg0, %c0_i32 : i32, i32
  }
}

</mosaic_0001>

<bundles_post_ra>
// kernel: tpu_custom_call.1
= control target key start
LH: loop header
LB: loop body
LE: loop exit
PB: predicated region body
PF: predicated region fallthrough
CT: control target
= control target key end

     0   :  { %19 = vsyncpa [#allocation3], 0  ;;  %s1977_s0 = inlined_call_operand.hbm [shape: f32[8,128], index: 0, kind: input, shape index: {}, may-alias: {0,11}]   ;;  %s1978_s1 = inlined_call_operand.hbm [shape: f32[8,128], index: 1, kind: input, shape index: {}, may-alias: {1,12}]   ;;  %s1979_s2 = inlined_call_operand.hbm [shape: f32[8,128], index: 2, kind: input, shape index: {}, may-alias: {2,13}]   ;;  %s1980_s3 = inlined_call_operand.vmem [shape: f32[8,128], index: 3, kind: input, shape index: {}]   ;;  %s1981_s4 = inlined_call_operand.vmem [shape: f32[8,128], index: 4, kind: input, shape index: {}]   ;;  %s1982_s5 = inlined_call_operand.hbm [shape: bf16[128,256], index: 5, kind: input, shape index: {}]   ;;  %s1983_s6 = inlined_call_operand.hbm [shape: bf16[256,128], index: 6, kind: input, shape index: {}]   ;;  %s1984_s7 = inlined_call_operand.hbm [shape: bf16[128,128], index: 7, kind: input, shape index: {}]   ;;  %s1985_s8 = inlined_call_operand.vmem [shape: f32[1,128], index: 8, kind: input, shape index: {}]   ;;  %s1986_s9 = inlined_call_operand.vmem [shape: f32[1,128], index: 9, kind: input, shape index: {}]   ;;  %s1987_s10 = inlined_call_operand.vmem [shape: f32[1,128], index: 10, kind: input, shape index: {}]   ;;  %s1988_s11 = inlined_call_operand.hbm [shape: f32[8,128], index: 11, kind: output, shape index: {0}, may-alias: {0,11}]   ;;  %s1989_s12 = inlined_call_operand.hbm [shape: f32[8,128], index: 12, kind: output, shape index: {1}, may-alias: {1,12}]   ;;  %s1990_s13 = inlined_call_operand.hbm [shape: f32[8,128], index: 13, kind: output, shape index: {2}, may-alias: {2,13}]  }
   0x1   :  { %20 = vsyncpa [#allocation6], 0 }
   0x2   :  { %21 = vsyncpa [#allocation9], 0 }
   0x3   :  { %22 = vsyncpa [#allocation12], 0 }
   0x4   :  { %23 = vsyncpa [#allocation4], 0  ;;  %s41_s26 = sshll.u32 %s1978_s1, 4  ;;  %s42_s26 = int_to_ptr.hbm [resolvable:$true] %s41_s26 }
   0x5   :  { %24 = vsyncpa [#allocation15], 0  ;;  %s1523_s27 = smov [#allocation5]   ;;  %s66_s14 = sshll.u32 %s1982_s5, 4  ;;  %s67_s14 = int_to_ptr.hbm [resolvable:$true] %s66_s14 }
   0x6   :  { %s43_s28 = sshll.u32 %s1523_s27, 4  ;;  %s1524_s15 = smov [#allocation8]   ;;  %s44_s28 = int_to_ptr.vmem [resolvable:$true] %s43_s28 }
   0x7   :  { %46 = dma.hbm_to_vmem [thread:$0]  %s42_s26, 128, %s44_s28, [#allocation6]  }
   0x8   :  { %s68_s16 = sshll.u32 %s1524_s15, 4  ;;  %s1525_s17 = smov 128   ;;  %s69_s16 = int_to_ptr.vmem [resolvable:$true] %s68_s16 }
   0x9   :  { %s1526_s3 = smov 8   ;;  %s30_s1 = sshll.u32 %s1977_s0, 4  ;;  %s31_s1 = int_to_ptr.hbm [resolvable:$true] %s30_s1 }
   0xa   :  { %74 = dma.hbm_to_vmem [thread:$0]  %s67_s14, 2048, %s69_s16, [#allocation9], %s1525_s17, %s1525_s17, %s1526_s3  }
   0xb   :  { %s1527_s20 = smov [#allocation2]   ;;  %s52_s5 = sshll.u32 %s1979_s2, 4  ;;  %s53_s5 = int_to_ptr.hbm [resolvable:$true] %s52_s5 }
   0xc   :  { %s32_s21 = sshll.u32 %s1527_s20, 4  ;;  %s1528_s24 = smov [#allocation7]   ;;  %s33_s21 = int_to_ptr.vmem [resolvable:$true] %s32_s21 }
   0xd   :  { %35 = dma.hbm_to_vmem [thread:$0]  %s31_s1, 128, %s33_s21, [#allocation3]  }
   0xe   :  { %s54_s25 = sshll.u32 %s1528_s24, 4  ;;  %s79_s28 = sshll.u32 %s1983_s6, 4  ;;  %s55_s25 = int_to_ptr.vmem [resolvable:$true] %s54_s25  ;;  %s80_s28 = int_to_ptr.hbm [resolvable:$true] %s79_s28 }
   0xf   :  { %57 = dma.hbm_to_vmem [thread:$0]  %s53_s5, 128, %s55_s25, [#allocation6]  }
  0x10   :  { %s1529_s0 = smov [#allocation10]   ;;  %s92_s15 = sshll.u32 %s1984_s7, 4  ;;  %s93_s15 = int_to_ptr.hbm [resolvable:$true] %s92_s15 }
  0x11   :  { %s81_s29 = sshll.u32 %s1529_s0, 4  ;;  %s1530_s16 = smov 64   ;;  %s82_s29 = int_to_ptr.vmem [resolvable:$true] %s81_s29 }
  0x12   :  { %s1531_s2 = smov 4   ;;  %s1532_s17 = smov [#allocation11]  }
  0x13   :  { %87 = dma.hbm_to_vmem [thread:$0]  %s80_s28, 2048, %s82_s29, [#allocation9], %s1530_s16, %s1530_s16, %s1531_s2  }
  0x14   :  { %s94_s3 = sshll.u32 %s1532_s17, 4  ;;  %s95_s3 = int_to_ptr.vmem [resolvable:$true] %s94_s3 }
  0x15   :  { %100 = dma.hbm_to_vmem [thread:$0]  %s93_s15, 1024, %s95_s3, [#allocation12], %s1530_s16, %s1530_s16, %s1531_s2  }
  0x16   :  { %1511 = dma.done.wait [#allocation3], 128  }
  0x17   :  { %1512 = vsyncadd [#allocation3], 4294967168 }
  0x18   :  { %1513 = dma.done.wait [#allocation6], 256  }
  0x19   :  { %1514 = vsyncadd [#allocation6], 4294967040 }
  0x1a   :  { %1515 = dma.done.wait [#allocation9], 4096  }
  0x1b   :  { %1516 = vsyncadd [#allocation9], 4294963200 }
  0x1c   :  { %1517 = dma.done.wait [#allocation12], 1024  }
  0x1d   :  { %1518 = vsyncadd [#allocation12], 4294966272  ;;  %v1245_v0 = vld [vmem:[#allocation11 + $0x38] sm:$0xff]  ;;  %v1260_v1 = vld [vmem:[#allocation8 + $0x74] sm:$0xf]  ;;  %s1018_s23 = sshll.u32 %s1989_s12, 4  ;;  %s1019_s23 = int_to_ptr.hbm [resolvable:$true] %s1018_s23 }
  0x1e   :  { %v1143_v2 = vld [vmem:[#allocation8 + $0x78] sm:$0xf0]  ;;  %v1258_v4 = vld [vmem:[#allocation8 + $0x64] sm:$0xf]  ;;  %v1135_v5 = vld [vmem:[#allocation8 + $0x68] sm:$0xf0]  ;;  %203 = vmatpush.bf16.msra.mxu0 %v1245_v0 }
  0x1f   :  { %v1625_v3 = vor.u32 %v1260_v1, %v1143_v2  ;;  %v1244_v6 = vld [vmem:[#allocation11 + $0x30] sm:$0xff]  ;;  %v1628_v7 = vor.u32 %v1258_v4, %v1135_v5  ;;  %v1127_v9 = vld [vmem:[#allocation8 + $0x58] sm:$0xf0]  ;;  %v1261_v12 = vld [vmem:[#allocation8 + $0x74] sm:$0xf0]  ;;  %s1535_s12 = smov [#allocation13]  }
  0x20   :  { %v1256_v8 = vld [vmem:[#allocation8 + $0x54] sm:$0xf]  ;;  %v1630_v10 = vld [vmem:[#allocation10 + $0x38] sm:$0xff]  ;;  %v1141_v11 = vld [vmem:[#allocation8 + $0x70] sm:$0xf]  ;;  %s1005_s5 = sshll.u32 %s1535_s12, 4  ;;  %s1006_s5 = int_to_ptr.vmem [resolvable:$true] %s1005_s5 }
  0x21   :  { %339 = vmatpush.bf16.msra.mxu2 %v1625_v3  ;;  %v1243_v13 = vld [vmem:[#allocation11 + $0x28] sm:$0xff]  ;;  %486 = vmatpush.bf16.msra.mxu3 %v1630_v10  ;;  %v1633_v14 = vor.u32 %v1261_v12, %v1141_v11  ;;  %v1635_v15 = vld [vmem:[#allocation10 + $0x30] sm:$0xff]  ;;  %v1133_v16 = vld [vmem:[#allocation8 + $0x60] sm:$0xf]  ;;  %v1638_v17 = vor.u32 %v1256_v8, %v1127_v9  ;;  %s1007_s26 = sshll.u32 %s1988_s11, 4  ;;  %s1536_s27 = smov [#allocation16]   ;;  %s1008_s26 = int_to_ptr.hbm [resolvable:$true] %s1007_s26 }
  0x22   :  { %204 = vmatpush.bf16.msra.mxu0 %v1244_v6  ;;  %v1259_v18 = vld [vmem:[#allocation8 + $0x64] sm:$0xf0]  ;;  %v1254_v19 = vld [vmem:[#allocation8 + $0x44] sm:$0xf]  ;;  %v1119_v20 = vld [vmem:[#allocation8 + $0x48] sm:$0xf0] }
  0x23   :  { %326 = vmatpush.bf16.msra.mxu1 %v1633_v14  ;;  %v1641_v21 = vor.u32 %v1259_v18, %v1133_v16  ;;  %v1125_v22 = vld [vmem:[#allocation8 + $0x50] sm:$0xf]  ;;  %v1257_v23 = vld [vmem:[#allocation8 + $0x54] sm:$0xf0]  ;;  %v1242_v24 = vld [vmem:[#allocation11 + $0x20] sm:$0xff]  ;;  %v1647_v26 = vor.u32 %v1254_v19, %v1119_v20  ;;  %s1027_s28 = sshll.u32 %s1536_s27, 4  ;;  %s1028_s28 = int_to_ptr.vmem [resolvable:$true] %s1027_s28 }
  0x24   :  { %v1644_v25 = vld [vmem:[#allocation10 + $0x28] sm:$0xff]  ;;  %v1252_v27 = vld [vmem:[#allocation8 + $0x34] sm:$0xf]  ;;  %v1111_v28 = vld [vmem:[#allocation8 + $0x38] sm:$0xf0]  ;;  %v1650_v29 = vor.u32 %v1257_v23, %v1125_v22  ;;  %s1029_s30 = sshll.u32 %s1990_s13, 4  ;;  %s1030_s30 = int_to_ptr.hbm [resolvable:$true] %s1029_s30 }
  0x25   :  { %340 = vmatpush.bf16.msra.mxu2 %v1628_v7  ;;  %487 = vmatpush.bf16.msra.mxu3 %v1635_v15  ;;  %v1117_v30 = vld [vmem:[#allocation8 + $0x40] sm:$0xf]  ;;  %v1255_v31 = vld [vmem:[#allocation8 + $0x44] sm:$0xf0]  ;;  %v1241_v32 = vld [vmem:[#allocation11 + $0x18] sm:$0xff]  ;;  %v1656_v34 = vor.u32 %v1252_v27, %v1111_v28 }
  0x26   :  { %205 = vmatpush.bf16.msra.mxu0 %v1243_v13  ;;  %v1653_v33 = vld [vmem:[#allocation10 + $0x20] sm:$0xff]  ;;  %v1103_v36 = vld [vmem:[#allocation8 + $0x28] sm:$0xf0]  ;;  %v1659_v37 = vor.u32 %v1255_v31, %v1117_v30  ;;  %v1109_v38 = vld [vmem:[#allocation8 + $0x30] sm:$0xf] }
  0x27   :  { %327 = vmatpush.bf16.msra.mxu1 %v1641_v21  ;;  %v1250_v35 = vld [vmem:[#allocation8 + $0x24] sm:$0xf]  ;;  %v1253_v39 = vld [vmem:[#allocation8 + $0x34] sm:$0xf0]  ;;  %v1240_v40 = vld [vmem:[#allocation11 + $0x10] sm:$0xff] }
  0x28   :  { %v1662_v41 = vld [vmem:[#allocation10 + $0x18] sm:$0xff]  ;;  %v131_v42 = vld [vmem:[%s1981_s4] sm:$0xff]  ;;  %v1668_v43 = vor.u32 %v1250_v35, %v1103_v36  ;;  %v1670_v44 = vld [vmem:[#allocation5] sm:$0xff]  ;;  %v1673_v47 = vor.u32 %v1253_v39, %v1109_v38 }
  0x29   :  { %341 = vmatpush.bf16.msra.mxu2 %v1638_v17  ;;  %488 = vmatpush.bf16.msra.mxu3 %v1644_v25  ;;  %v1248_v45 = vld [vmem:[#allocation8 + $0x14] sm:$0xf]  ;;  %v1095_v46 = vld [vmem:[#allocation8 + $0x18] sm:$0xf0]  ;;  %v132_v48 = vmax.f32 %v131_v42, 0.0  ;;  %v1239_v51 = vld [vmem:[#allocation11 + $0x8] sm:$0xff] }
  0x2a   :  { %206 = vmatpush.bf16.msra.mxu0 %v1242_v24  ;;  %v1101_v49 = vld [vmem:[#allocation8 + $0x20] sm:$0xf]  ;;  %v1251_v50 = vld [vmem:[#allocation8 + $0x24] sm:$0xf0]  ;;  %v227_v52 = vmax.f32 %v1670_v44, 0.0  ;;  %v1677_v53 = vld [vmem:[#allocation10 + $0x10] sm:$0xff]  ;;  %v1682_v55 = vor.u32 %v1248_v45, %v1095_v46 }
  0x2b   :  { %328 = vmatpush.bf16.msra.mxu1 %v1650_v29  ;;  %v1679_v54 = vld [vmem:[#allocation7] sm:$0xff]  ;;  %v1246_v56 = vld [vmem:[#allocation8 + $0x4] sm:$0xf]  ;;  %v1087_v57 = vld [vmem:[#allocation8 + $0x8] sm:$0xf0]  ;;  %v1685_v58 = vor.u32 %v1251_v50, %v1101_v49  ;;  %v133_v59 = vmin.f32 %v132_v48, 1.0 }
  0x2c   :  { %v1093_v60 = vld [vmem:[#allocation8 + $0x10] sm:$0xf]  ;;  %v1249_v61 = vld [vmem:[#allocation8 + $0x14] sm:$0xf0]  ;;  %v352_v62 = vmax.f32 %v1679_v54, 0.0  ;;  %v1238_v63 = vld [vmem:[#allocation11] sm:$0xff]  ;;  %v1692_v2 = vor.u32 %v1246_v56, %v1087_v57 }
  0x2d   :  { %342 = vmatpush.bf16.msra.mxu2 %v1647_v26  ;;  %489 = vmatpush.bf16.msra.mxu3 %v1653_v33  ;;  %v228_v0 = vmin.f32 %v227_v52, 1.0  ;;  %v1689_v1 = vld [vmem:[#allocation10 + $0x8] sm:$0xff]  ;;  %v1694_v4 = vld [vmem:[#allocation10 + $0x78] sm:$0xff]  ;;  %v1697_v5 = vor.u32 %v1249_v61, %v1093_v60  ;;  %v134_v6 = vpack.c.bf16 %v133_v59, %v133_v59  ;;  %v1085_v8 = vld [vmem:[#allocation8] sm:$0xf]  ;;  %vm523_vm0 = vcmp.ge.f32.partialorder %v1679_v54, 0.0 }
  0x2e   :  { %207 = vmatpush.bf16.msra.mxu0 %v1241_v32  ;;  %v1247_v9 = vld [vmem:[#allocation8 + $0x4] sm:$0xf0]  ;;  %v353_v11 = vmin.f32 %v352_v62, 1.0  ;;  %v1700_v13 = vld [vmem:[#allocation10] sm:$0xff]  ;;  %v1704_v16 = vld [vmem:[#allocation10 + $0x70] sm:$0xff]  ;;  %vm524_vm1 = vcmp.le.f32.partialorder %v1679_v54, 1.0 }
  0x2f   :  { %329 = vmatpush.bf16.msra.mxu1 %v1659_v37  ;;  %v229_v12 = vpack.c.bf16 %v228_v0, %v228_v0  ;;  %v1707_v18 = vor.u32 %v1247_v9, %v1085_v8  ;;  %v1712_v20 = vld [vmem:[#allocation10 + $0x68] sm:$0xff]  ;;  %v1719_v22 = vld [vmem:[#allocation10 + $0x60] sm:$0xff]  ;;  %v1725_v23 = vld [vmem:[#allocation10 + $0x58] sm:$0xff]  ;;  %v1533_v48 = vmov 0.0   ;;  %v522_v52 = vsub.f32 0.0, %v1679_v54 }
  0x30   :  { %v356_v19 = vpack.c.bf16 %v353_v11, %v353_v11  ;;  %v1731_v24 = vld [vmem:[#allocation10 + $0x50] sm:$0xff]  ;;  %v1733_v27 = vld [vmem:[#allocation2] sm:$0xff]  ;;  %v1746_v32 = vld [vmem:[#allocation10 + $0x40] sm:$0xff]  ;;  %vm515_vm3 = vcmp.ge.f32.partialorder %v1670_v44, 0.0  ;;  %vm516_vm4 = vcmp.le.f32.partialorder %v1670_v44, 1.0 }
  0x31   :  { %343 = vmatpush.bf16.msra.mxu2 %v1656_v34  ;;  %490 = vmatpush.bf16.msra.mxu3 %v1662_v41  ;;  %v354_v28 = vmax.f32 %v1733_v27, 0.0  ;;  %v1740_v30 = vld [vmem:[#allocation10 + $0x48] sm:$0xff]  ;;  %vm525_vm2 = vmand %vm523_vm0, %vm524_vm1  ;;  %v512_v42 = vsub.f32 0.0, %v1733_v27 }
  0x32   :  { %208 = vmatpush.bf16.msra.mxu0 %v1240_v40  ;;  %v1292_v36 = vld [vmem:[%s1987_s10] ss:$0 sm:$0xff]  ;;  %v1212_v49 = vsel %vm525_vm2, 1.0, %v1533_v48  ;;  %vm517_vm5 = vmand %vm515_vm3, %vm516_vm4 }
  0x33   :  { %330 = vmatpush.bf16.msra.mxu1 %v1673_v47  ;;  %v355_v31 = vmin.f32 %v354_v28, 1.0  ;;  %v1805_v39 = vld [vmem:[%s1985_s8] ss:$0 sm:$0xff] }
  0x35   :  { %344 = vmatpush.bf16.msra.mxu2 %v1668_v43  ;;  %491 = vmatpush.bf16.msra.mxu3 %v1677_v53  ;;  %v357_v35 = vpack.c.bf16 %v355_v31, %v355_v31 }
  0x36   :  { %209 = vmatpush.bf16.msra.mxu0 %v1239_v51 }
  0x37   :  { %331 = vmatpush.bf16.msra.mxu1 %v1685_v58 }
  0x39   :  { %345 = vmatpush.bf16.msra.mxu2 %v1682_v55  ;;  %492 = vmatpush.bf16.msra.mxu3 %v1689_v1 }
  0x3a   :  { %210 = vmatpush.bf16.msra.mxu0 %v1238_v63 }
  0x3b   :  { %332 = vmatpush.bf16.msra.mxu1 %v1697_v5 }
  0x3d   :  { %346 = vmatpush.bf16.msra.mxu2 %v1692_v2  ;;  %211 = vmatmul.bf16.vlgmr.msra.gmra.mxu0 %v134_v6 }
  0x3e   :  { %499 = vmatpush.bf16.msrb.mxu0 %v1694_v4  ;;  %493 = vmatpush.bf16.msra.mxu3 %v1700_v13 }
  0x3f   :  { %333 = vmatpush.bf16.msra.mxu1 %v1707_v18 }
  0x40   :  { %347 = vmatmul.bf16.vlgmr.msra.gmra.mxu2 %v229_v12 }
  0x41   :  { %558 = vmatpush.bf16.msrb.mxu2 %v1625_v3  ;;  %494 = vmatmul.bf16.vlgmr.msra.gmra.mxu3 %v356_v19 }
  0x42   :  { %500 = vmatpush.bf16.msrb.mxu0 %v1704_v16  ;;  %577 = vmatpush.bf16.msrb.mxu3 %v1630_v10 }
  0x43   :  { %545 = vmatpush.bf16.msrb.mxu1 %v1633_v14 }
  0x44   :  { %334 = vmatmul.bf16.vlgmr.msra.gmra.mxu1 %v229_v12 }
  0x45   :  { %559 = vmatpush.bf16.msrb.mxu2 %v1628_v7 }
  0x46   :  { %501 = vmatpush.bf16.msrb.mxu0 %v1712_v20  ;;  %578 = vmatpush.bf16.msrb.mxu3 %v1635_v15 }
  0x47   :  { %546 = vmatpush.bf16.msrb.mxu1 %v1641_v21 }
  0x49   :  { %560 = vmatpush.bf16.msrb.mxu2 %v1638_v17 }
  0x4a   :  { %502 = vmatpush.bf16.msrb.mxu0 %v1719_v22  ;;  %579 = vmatpush.bf16.msrb.mxu3 %v1644_v25 }
  0x4b   :  { %547 = vmatpush.bf16.msrb.mxu1 %v1650_v29 }
  0x4d   :  { %561 = vmatpush.bf16.msrb.mxu2 %v1647_v26 }
  0x4e   :  { %503 = vmatpush.bf16.msrb.mxu0 %v1725_v23  ;;  %580 = vmatpush.bf16.msrb.mxu3 %v1653_v33 }
  0x4f   :  { %548 = vmatpush.bf16.msrb.mxu1 %v1659_v37 }
  0x51   :  { %562 = vmatpush.bf16.msrb.mxu2 %v1656_v34 }
  0x52   :  { %504 = vmatpush.bf16.msrb.mxu0 %v1731_v24  ;;  %581 = vmatpush.bf16.msrb.mxu3 %v1662_v41 }
  0x53   :  { %549 = vmatpush.bf16.msrb.mxu1 %v1673_v47 }
  0x55   :  { %563 = vmatpush.bf16.msrb.mxu2 %v1668_v43 }
  0x56   :  { %505 = vmatpush.bf16.msrb.mxu0 %v1740_v30  ;;  %582 = vmatpush.bf16.msrb.mxu3 %v1677_v53 }
  0x57   :  { %550 = vmatpush.bf16.msrb.mxu1 %v1685_v58 }
  0x59   :  { %564 = vmatpush.bf16.msrb.mxu2 %v1682_v55 }
  0x5a   :  { %506 = vmatpush.bf16.msrb.mxu0 %v1746_v32  ;;  %583 = vmatpush.bf16.msrb.mxu3 %v1689_v1 }
  0x5b   :  { %551 = vmatpush.bf16.msrb.mxu1 %v1697_v5 }
  0x5d   :  { %565 = vmatpush.bf16.msrb.mxu2 %v1692_v2  ;;  %507 = vmatmul.bf16.vlgmr.msrb.gmra.mxu0 %v357_v35 }
  0x5e   :  { %590 = vmatpush.bf16.msra.mxu0 %v1694_v4  ;;  %584 = vmatpush.bf16.msrb.mxu3 %v1700_v13 }
  0x5f   :  { %552 = vmatpush.bf16.msrb.mxu1 %v1707_v18 }
  0x61   :  { %649 = vmatpush.bf16.msra.mxu2 %v1625_v3 }
  0x62   :  { %591 = vmatpush.bf16.msra.mxu0 %v1704_v16  ;;  %668 = vmatpush.bf16.msra.mxu3 %v1630_v10 }
  0x63   :  { %636 = vmatpush.bf16.msra.mxu1 %v1633_v14 }
  0x65   :  { %650 = vmatpush.bf16.msra.mxu2 %v1628_v7 }
  0x66   :  { %592 = vmatpush.bf16.msra.mxu0 %v1712_v20  ;;  %669 = vmatpush.bf16.msra.mxu3 %v1635_v15 }
  0x67   :  { %637 = vmatpush.bf16.msra.mxu1 %v1641_v21 }
  0x69   :  { %651 = vmatpush.bf16.msra.mxu2 %v1638_v17 }
  0x6a   :  { %593 = vmatpush.bf16.msra.mxu0 %v1719_v22  ;;  %670 = vmatpush.bf16.msra.mxu3 %v1644_v25 }
  0x6b   :  { %638 = vmatpush.bf16.msra.mxu1 %v1650_v29 }
  0x6d   :  { %652 = vmatpush.bf16.msra.mxu2 %v1647_v26 }
  0x6e   :  { %594 = vmatpush.bf16.msra.mxu0 %v1725_v23  ;;  %671 = vmatpush.bf16.msra.mxu3 %v1653_v33 }
  0x6f   :  { %639 = vmatpush.bf16.msra.mxu1 %v1659_v37 }
  0x71   :  { %653 = vmatpush.bf16.msra.mxu2 %v1656_v34 }
  0x72   :  { %595 = vmatpush.bf16.msra.mxu0 %v1731_v24  ;;  %672 = vmatpush.bf16.msra.mxu3 %v1662_v41 }
  0x73   :  { %640 = vmatpush.bf16.msra.mxu1 %v1673_v47 }
  0x75   :  { %654 = vmatpush.bf16.msra.mxu2 %v1668_v43 }
  0x76   :  { %596 = vmatpush.bf16.msra.mxu0 %v1740_v30  ;;  %673 = vmatpush.bf16.msra.mxu3 %v1677_v53 }
  0x77   :  { %641 = vmatpush.bf16.msra.mxu1 %v1685_v58 }
  0x79   :  { %655 = vmatpush.bf16.msra.mxu2 %v1682_v55 }
  0x7a   :  { %597 = vmatpush.bf16.msra.mxu0 %v1746_v32  ;;  %674 = vmatpush.bf16.msra.mxu3 %v1689_v1 }
  0x7b   :  { %642 = vmatpush.bf16.msra.mxu1 %v1697_v5 }
  0x7d   :  { %656 = vmatpush.bf16.msra.mxu2 %v1692_v2 }
  0x7e   :  { %681 = vmatpush.bf16.msrb.mxu0 %v1694_v4  ;;  %675 = vmatpush.bf16.msra.mxu3 %v1700_v13 }
  0x7f   :  { %643 = vmatpush.bf16.msra.mxu1 %v1707_v18 }
  0x82   :  { %682 = vmatpush.bf16.msrb.mxu0 %v1704_v16 }
  0x86   :  { %683 = vmatpush.bf16.msrb.mxu0 %v1712_v20 }
  0x8a   :  { %684 = vmatpush.bf16.msrb.mxu0 %v1719_v22 }
  0x8e   :  { %685 = vmatpush.bf16.msrb.mxu0 %v1725_v23 }
  0x92   :  { %686 = vmatpush.bf16.msrb.mxu0 %v1731_v24 }
  0x96   :  { %687 = vmatpush.bf16.msrb.mxu0 %v1740_v30 }
  0x9a   :  { %688 = vmatpush.bf16.msrb.mxu0 %v1746_v32 }
  0xba   :  { %v212_v38 = vpop.f32.mrf.mxu0 }
  0xbb   :  { %v1807_v40 = vadd.f32 %v1292_v36, %v212_v38  ;;  %v1211_v36 = vsel %vm517_vm5, 1.0, %v1533_v48 }
  0xc1   :  { %v335_v45 = vpop.f32.mrf.mxu1 }
  0xc2   :  { %v336_v50 = vadd.f32 %v1805_v39, %v335_v45  ;;  %v214_v56 = vpop.f32.mrf.mxu0 }
  0xc3   :  { %v348_v46 = vpop.f32.mrf.mxu2 }
  0xc4   :  { %v349_v51 = vadd.f32 %v348_v46, %v1807_v40  ;;  %v513_v57 = vadd.f32 %v512_v42, %v336_v50  ;;  %v495_v60 = vpop.f32.mrf.mxu3  ;;  %v514_v42 = vsub.f32 0.0, %v1670_v44 }
  0xc6   :  { %v528_v59 = vmul.f32 %v1212_v49, %v349_v51  ;;  %v530_v61 = vmul.f32 0.2, %v513_v57 }
  0xc8   :  { %v529_v62 = vadd.f32 %v528_v59, %v522_v52  ;;  %v1815_v63 = vadd.f32 %v530_v61, %v1733_v27  ;;  %v1826_v27 = vld [vmem:[%s1986_s9] ss:$0 sm:$0xff]  ;;  %s1534_s9 = smov [#allocation14]  }
  0xc9   :  { %v337_v6 = vpop.f32.mrf.mxu1  ;;  %s1016_s20 = sshll.u32 %s1534_s9, 4  ;;  %s1017_s20 = int_to_ptr.vmem [resolvable:$true] %s1016_s20 }
  0xca   :  { %v534_v0 = vmul.f32 0.2, %v529_v62  ;;  %v1215_v8 = vclamp-gez-f32 %v1815_v63, 1.0 }
  0xcb   :  { %v350_v9 = vpop.f32.mrf.mxu2 }
  0xcc   :  { %v1819_v11 = vadd.f32 %v534_v0, %v1679_v54  ;;  %v576_v12 = vpack.c.bf16 %v1215_v8, %v1215_v8  ;;  %v497_v28 = vpop.f32.mrf.mxu3  ;;  %v496_v54 = vadd.f32 %v1826_v27, %v495_v60 }
  0xce   :  { %v1214_v19 = vclamp-gez-f32 %v1819_v11, 1.0  ;;  %598 = vmatmul.bf16.vlgmr.msra.gmra.mxu0 %v576_v12 }
  0xcf   :  { %772 = vmatpush.bf16.msra.mxu0 %v1694_v4 }
  0xd0   :  { %v575_v31 = vpack.c.bf16 %v1214_v19, %v1214_v19 }
  0xd2   :  { %585 = vmatmul.bf16.vlgmr.msrb.gmra.mxu3 %v575_v31  ;;  %v536_v31 = vmax.f32 %v1815_v63, 0.0 }
  0xd3   :  { %759 = vmatpush.bf16.msrb.mxu3 %v1630_v10  ;;  %773 = vmatpush.bf16.msra.mxu0 %v1704_v16 }
  0xd7   :  { %760 = vmatpush.bf16.msrb.mxu3 %v1635_v15  ;;  %774 = vmatpush.bf16.msra.mxu0 %v1712_v20 }
  0xda   :  { %v508_v35 = vpop.f32.mrf.mxu0 }
  0xdb   :  { %v509_v38 = vadd.f32 %v508_v35, %v496_v54  ;;  %761 = vmatpush.bf16.msrb.mxu3 %v1644_v25  ;;  %775 = vmatpush.bf16.msra.mxu0 %v1719_v22  ;;  %v540_v54 = vmax.f32 %v1819_v11, 0.0 }
  0xdd   :  { %v520_v45 = vmul.f32 %v1211_v36, %v509_v38  ;;  %v537_v36 = vmin.f32 %v536_v31, 1.0 }
  0xdf   :  { %v521_v46 = vadd.f32 %v520_v45, %v514_v42  ;;  %762 = vmatpush.bf16.msrb.mxu3 %v1653_v33  ;;  %776 = vmatpush.bf16.msra.mxu0 %v1725_v23  ;;  %v541_v42 = vmin.f32 %v540_v54, 1.0 }
  0xe1   :  { %v532_v49 = vmul.f32 0.2, %v521_v46  ;;  %vm614_vm9 = vcmp.ge.f32.partialorder %v541_v42, 0.0  ;;  %vm615_vm10 = vcmp.le.f32.partialorder %v541_v42, 1.0 }
  0xe2   :  { %v510_v50 = vpop.f32.mrf.mxu0  ;;  %vm616_vm11 = vmand %vm614_vm9, %vm615_vm10 }
  0xe3   :  { %v533_v51 = vadd.f32 %v532_v49, %v1670_v44  ;;  %763 = vmatpush.bf16.msrb.mxu3 %v1662_v41  ;;  %777 = vmatpush.bf16.msra.mxu0 %v1731_v24  ;;  %v603_v50 = vsub.f32 0.0, %v537_v36 }
  0xe5   :  { %v1213_v52 = vclamp-gez-f32 %v533_v51, 1.0  ;;  %v538_v44 = vmax.f32 %v533_v51, 0.0 }
  0xe7   :  { %v544_v56 = vpack.c.bf16 %v1213_v52, %v1213_v52  ;;  %764 = vmatpush.bf16.msrb.mxu3 %v1677_v53  ;;  %778 = vmatpush.bf16.msra.mxu0 %v1740_v30  ;;  %v539_v59 = vmin.f32 %v538_v44, 1.0  ;;  %v1217_v44 = vsel %vm616_vm11, 1.0, %v1533_v48 }
  0xe9   :  { %553 = vmatmul.bf16.vlgmr.msrb.gmra.mxu1 %v544_v56  ;;  %566 = vmatmul.bf16.vlgmr.msrb.gmra.mxu2 %v544_v56  ;;  %vm606_vm6 = vcmp.ge.f32.partialorder %v539_v59, 0.0  ;;  %vm607_vm7 = vcmp.le.f32.partialorder %v539_v59, 1.0  ;;  %v605_v8 = vsub.f32 0.0, %v539_v59 }
  0xea   :  { %727 = vmatpush.bf16.msrb.mxu1 %v1633_v14  ;;  %740 = vmatpush.bf16.msrb.mxu2 %v1625_v3  ;;  %vm608_vm8 = vmand %vm606_vm6, %vm607_vm7 }
  0xeb   :  { %765 = vmatpush.bf16.msrb.mxu3 %v1689_v1  ;;  %779 = vmatpush.bf16.msra.mxu0 %v1746_v32  ;;  %v1216_v6 = vsel %vm608_vm8, 1.0, %v1533_v48 }
  0xee   :  { %728 = vmatpush.bf16.msrb.mxu1 %v1641_v21  ;;  %741 = vmatpush.bf16.msrb.mxu2 %v1628_v7 }
  0xef   :  { %766 = vmatpush.bf16.msrb.mxu3 %v1700_v13 }
  0xf2   :  { %729 = vmatpush.bf16.msrb.mxu1 %v1650_v29  ;;  %742 = vmatpush.bf16.msrb.mxu2 %v1638_v17 }
  0xf6   :  { %730 = vmatpush.bf16.msrb.mxu1 %v1659_v37  ;;  %743 = vmatpush.bf16.msrb.mxu2 %v1647_v26 }
  0xfa   :  { %731 = vmatpush.bf16.msrb.mxu1 %v1673_v47  ;;  %744 = vmatpush.bf16.msrb.mxu2 %v1656_v34 }
  0xfe   :  { %732 = vmatpush.bf16.msrb.mxu1 %v1685_v58  ;;  %745 = vmatpush.bf16.msrb.mxu2 %v1668_v43 }
 0x102   :  { %733 = vmatpush.bf16.msrb.mxu1 %v1697_v5  ;;  %746 = vmatpush.bf16.msrb.mxu2 %v1682_v55 }
 0x106   :  { %734 = vmatpush.bf16.msrb.mxu1 %v1707_v18  ;;  %747 = vmatpush.bf16.msrb.mxu2 %v1692_v2 }
 0x14b   :  { %v599_v57 = vpop.f32.mrf.mxu0 }
 0x153   :  { %v601_v60 = vpop.f32.mrf.mxu0 }
 0x154   :  { %v613_v60 = vsub.f32 0.0, %v541_v42 }
 0x155   :  { %v586_v61 = vpop.f32.mrf.mxu3 }
 0x156   :  { %v587_v62 = vadd.f32 %v1826_v27, %v586_v61 }
 0x158   :  { %v600_v0 = vadd.f32 %v599_v57, %v587_v62 }
 0x15a   :  { %v611_v9 = vmul.f32 %v1216_v6, %v600_v0 }
 0x15c   :  { %v612_v12 = vadd.f32 %v611_v9, %v605_v8 }
 0x15d   :  { %v588_v19 = vpop.f32.mrf.mxu3 }
 0x15e   :  { %v623_v28 = vmul.f32 0.2, %v612_v12 }
 0x160   :  { %v1869_v35 = vadd.f32 %v623_v28, %v539_v59 }
 0x162   :  { %v1218_v38 = vclamp-gez-f32 %v1869_v35, 1.0 }
 0x164   :  { %v635_v45 = vpack.c.bf16 %v1218_v38, %v1218_v38 }
 0x166   :  { %v554_v46 = vpop.f32.mrf.mxu1  ;;  %644 = vmatmul.bf16.vlgmr.msra.gmra.mxu1 %v635_v45  ;;  %657 = vmatmul.bf16.vlgmr.msra.gmra.mxu2 %v635_v45 }
 0x167   :  { %v555_v49 = vadd.f32 %v1805_v39, %v554_v46  ;;  %818 = vmatpush.bf16.msra.mxu1 %v1633_v14  ;;  %831 = vmatpush.bf16.msra.mxu2 %v1625_v3 }
 0x169   :  { %v604_v63 = vadd.f32 %v603_v50, %v555_v49 }
 0x16b   :  { %v621_v11 = vmul.f32 0.2, %v604_v63  ;;  %819 = vmatpush.bf16.msra.mxu1 %v1641_v21  ;;  %832 = vmatpush.bf16.msra.mxu2 %v1628_v7 }
 0x16c   :  { %v567_v51 = vpop.f32.mrf.mxu2 }
 0x16d   :  { %v622_v52 = vadd.f32 %v621_v11, %v537_v36  ;;  %v568_v56 = vadd.f32 %v567_v51, %v1807_v40 }
 0x16e   :  { %v556_v57 = vpop.f32.mrf.mxu1 }
 0x16f   :  { %v1220_v59 = vclamp-gez-f32 %v622_v52, 1.0  ;;  %v619_v61 = vmul.f32 %v1217_v44, %v568_v56  ;;  %820 = vmatpush.bf16.msra.mxu1 %v1650_v29  ;;  %833 = vmatpush.bf16.msra.mxu2 %v1638_v17  ;;  %v627_v28 = vmax.f32 %v622_v52, 0.0 }
 0x171   :  { %v620_v62 = vadd.f32 %v619_v61, %v613_v60  ;;  %v667_v0 = vpack.c.bf16 %v1220_v59, %v1220_v59  ;;  %v628_v54 = vmin.f32 %v627_v28, 1.0 }
 0x173   :  { %v625_v6 = vmul.f32 0.2, %v620_v62  ;;  %689 = vmatmul.bf16.vlgmr.msrb.gmra.mxu0 %v667_v0  ;;  %821 = vmatpush.bf16.msra.mxu1 %v1659_v37  ;;  %v694_v45 = vsub.f32 0.0, %v628_v54 }
 0x174   :  { %v569_v8 = vpop.f32.mrf.mxu2  ;;  %834 = vmatpush.bf16.msra.mxu2 %v1647_v26  ;;  %863 = vmatpush.bf16.msrb.mxu0 %v1694_v4 }
 0x175   :  { %v626_v9 = vadd.f32 %v625_v6, %v541_v42  ;;  %v629_v8 = vmax.f32 %v1869_v35, 0.0 }
 0x177   :  { %v1219_v12 = vclamp-gez-f32 %v626_v9, 1.0  ;;  %822 = vmatpush.bf16.msra.mxu1 %v1673_v47  ;;  %v631_v31 = vmax.f32 %v626_v9, 0.0 }
 0x178   :  { %835 = vmatpush.bf16.msra.mxu2 %v1656_v34  ;;  %864 = vmatpush.bf16.msrb.mxu0 %v1704_v16 }
 0x179   :  { %v666_v19 = vpack.c.bf16 %v1219_v12, %v1219_v12  ;;  %v632_v36 = vmin.f32 %v631_v31, 1.0 }
 0x17b   :  { %676 = vmatmul.bf16.vlgmr.msra.gmra.mxu3 %v666_v19  ;;  %823 = vmatpush.bf16.msra.mxu1 %v1685_v58  ;;  %vm705_vm12 = vcmp.ge.f32.partialorder %v632_v36, 0.0  ;;  %vm706_vm13 = vcmp.le.f32.partialorder %v632_v36, 1.0  ;;  %v704_v44 = vsub.f32 0.0, %v632_v36  ;;  %v630_v19 = vmin.f32 %v629_v8, 1.0 }
 0x17c   :  { %836 = vmatpush.bf16.msra.mxu2 %v1668_v43  ;;  %850 = vmatpush.bf16.msra.mxu3 %v1630_v10  ;;  %vm707_vm14 = vmand %vm705_vm12, %vm706_vm13 }
 0x17d   :  { %865 = vmatpush.bf16.msrb.mxu0 %v1712_v20  ;;  %v1222_v51 = vsel %vm707_vm14, 1.0, %v1533_v48  ;;  %vm697_vm15 = vcmp.ge.f32.partialorder %v630_v19, 0.0  ;;  %vm698_vm0 = vcmp.le.f32.partialorder %v630_v19, 1.0 }
 0x17e   :  { %vm699_vm1 = vmand %vm697_vm15, %vm698_vm0 }
 0x17f   :  { %824 = vmatpush.bf16.msra.mxu1 %v1697_v5 }
 0x180   :  { %837 = vmatpush.bf16.msra.mxu2 %v1682_v55  ;;  %851 = vmatpush.bf16.msra.mxu3 %v1635_v15 }
 0x181   :  { %866 = vmatpush.bf16.msrb.mxu0 %v1719_v22 }
 0x183   :  { %825 = vmatpush.bf16.msra.mxu1 %v1707_v18 }
 0x184   :  { %838 = vmatpush.bf16.msra.mxu2 %v1692_v2  ;;  %852 = vmatpush.bf16.msra.mxu3 %v1644_v25 }
 0x185   :  { %867 = vmatpush.bf16.msrb.mxu0 %v1725_v23 }
 0x188   :  { %853 = vmatpush.bf16.msra.mxu3 %v1653_v33 }
 0x189   :  { %868 = vmatpush.bf16.msrb.mxu0 %v1731_v24 }
 0x18c   :  { %854 = vmatpush.bf16.msra.mxu3 %v1662_v41 }
 0x18d   :  { %869 = vmatpush.bf16.msrb.mxu0 %v1740_v30 }
 0x190   :  { %855 = vmatpush.bf16.msra.mxu3 %v1677_v53 }
 0x191   :  { %870 = vmatpush.bf16.msrb.mxu0 %v1746_v32 }
 0x194   :  { %856 = vmatpush.bf16.msra.mxu3 %v1689_v1 }
 0x198   :  { %857 = vmatpush.bf16.msra.mxu3 %v1700_v13 }
 0x1e3   :  { %v645_v38 = vpop.f32.mrf.mxu1 }
 0x1e4   :  { %v646_v42 = vadd.f32 %v1805_v39, %v645_v38 }
 0x1e6   :  { %v695_v46 = vadd.f32 %v694_v45, %v646_v42 }
 0x1e8   :  { %v712_v49 = vmul.f32 0.2, %v695_v46 }
 0x1e9   :  { %v658_v50 = vpop.f32.mrf.mxu2 }
 0x1ea   :  { %v1908_v63 = vadd.f32 %v712_v49, %v628_v54  ;;  %v659_v11 = vadd.f32 %v658_v50, %v1807_v40 }
 0x1eb   :  { %v647_v52 = vpop.f32.mrf.mxu1 }
 0x1ec   :  { %v1225_v56 = vclamp-gez-f32 %v1908_v63, 1.0  ;;  %v710_v57 = vmul.f32 %v1222_v51, %v659_v11 }
 0x1ee   :  { %v711_v59 = vadd.f32 %v710_v57, %v704_v44  ;;  %v758_v60 = vpack.c.bf16 %v1225_v56, %v1225_v56 }
 0x1f0   :  { %v690_v61 = vpop.f32.mrf.mxu0  ;;  %v716_v62 = vmul.f32 0.2, %v711_v59  ;;  %780 = vmatmul.bf16.vlgmr.msra.gmra.mxu0 %v758_v60 }
 0x1f1   :  { %v660_v0 = vpop.f32.mrf.mxu2  ;;  %954 = vmatpush.bf16.msra.mxu0 %v1694_v4 }
 0x1f2   :  { %v1914_v6 = vadd.f32 %v716_v62, %v632_v36 }
 0x1f4   :  { %v1224_v9 = vclamp-gez-f32 %v1914_v6, 1.0 }
 0x1f5   :  { %955 = vmatpush.bf16.msra.mxu0 %v1704_v16  ;;  %v1221_v16 = vsel %vm699_vm1, 1.0, %v1533_v48 }
 0x1f6   :  { %v757_v12 = vpack.c.bf16 %v1224_v9, %v1224_v9 }
 0x1f8   :  { %v692_v28 = vpop.f32.mrf.mxu0  ;;  %767 = vmatmul.bf16.vlgmr.msrb.gmra.mxu3 %v757_v12 }
 0x1f9   :  { %941 = vmatpush.bf16.msrb.mxu3 %v1630_v10  ;;  %956 = vmatpush.bf16.msra.mxu0 %v1712_v20  ;;  %v696_v10 = vsub.f32 0.0, %v630_v19 }
 0x1fd   :  { %942 = vmatpush.bf16.msrb.mxu3 %v1635_v15  ;;  %957 = vmatpush.bf16.msra.mxu0 %v1719_v22 }
 0x1fe   :  { %v677_v31 = vpop.f32.mrf.mxu3 }
 0x1ff   :  { %v678_v4 = vadd.f32 %v1826_v27, %v677_v31 }
 0x201   :  { %v691_v35 = vadd.f32 %v690_v61, %v678_v4  ;;  %943 = vmatpush.bf16.msrb.mxu3 %v1644_v25  ;;  %958 = vmatpush.bf16.msra.mxu0 %v1725_v23 }
 0x203   :  { %v702_v54 = vmul.f32 %v1221_v16, %v691_v35 }
 0x205   :  { %v703_v20 = vadd.f32 %v702_v54, %v696_v10  ;;  %944 = vmatpush.bf16.msrb.mxu3 %v1653_v33  ;;  %959 = vmatpush.bf16.msra.mxu0 %v1731_v24 }
 0x206   :  { %v679_v36 = vpop.f32.mrf.mxu3 }
 0x207   :  { %v714_v15 = vmul.f32 0.2, %v703_v20 }
 0x209   :  { %v715_v22 = vadd.f32 %v714_v15, %v630_v19  ;;  %945 = vmatpush.bf16.msrb.mxu3 %v1662_v41  ;;  %960 = vmatpush.bf16.msra.mxu0 %v1740_v30 }
 0x20b   :  { %v1223_v38 = vclamp-gez-f32 %v715_v22, 1.0 }
 0x20d   :  { %v726_v42 = vpack.c.bf16 %v1223_v38, %v1223_v38  ;;  %946 = vmatpush.bf16.msrb.mxu3 %v1677_v53  ;;  %961 = vmatpush.bf16.msra.mxu0 %v1746_v32  ;;  %v722_v53 = vmax.f32 %v1914_v6, 0.0 }
 0x20f   :  { %735 = vmatmul.bf16.vlgmr.msrb.gmra.mxu1 %v726_v42  ;;  %748 = vmatmul.bf16.vlgmr.msrb.gmra.mxu2 %v726_v42 }
 0x210   :  { %909 = vmatpush.bf16.msrb.mxu1 %v1633_v14  ;;  %922 = vmatpush.bf16.msrb.mxu2 %v1625_v3 }
 0x211   :  { %947 = vmatpush.bf16.msrb.mxu3 %v1689_v1 }
 0x214   :  { %910 = vmatpush.bf16.msrb.mxu1 %v1641_v21  ;;  %923 = vmatpush.bf16.msrb.mxu2 %v1628_v7  ;;  %v720_v7 = vmax.f32 %v715_v22, 0.0 }
 0x215   :  { %948 = vmatpush.bf16.msrb.mxu3 %v1700_v13 }
 0x216   :  { %v721_v14 = vmin.f32 %v720_v7, 1.0 }
 0x218   :  { %911 = vmatpush.bf16.msrb.mxu1 %v1650_v29  ;;  %924 = vmatpush.bf16.msrb.mxu2 %v1638_v17  ;;  %vm788_vm2 = vcmp.ge.f32.partialorder %v721_v14, 0.0  ;;  %vm789_vm3 = vcmp.le.f32.partialorder %v721_v14, 1.0  ;;  %v787_v33 = vsub.f32 0.0, %v721_v14 }
 0x219   :  { %vm790_vm4 = vmand %vm788_vm2, %vm789_vm3 }
 0x21a   :  { %v1226_v29 = vsel %vm790_vm4, 1.0, %v1533_v48 }
 0x21c   :  { %912 = vmatpush.bf16.msrb.mxu1 %v1659_v37  ;;  %925 = vmatpush.bf16.msrb.mxu2 %v1647_v26 }
 0x220   :  { %913 = vmatpush.bf16.msrb.mxu1 %v1673_v47  ;;  %926 = vmatpush.bf16.msrb.mxu2 %v1656_v34  ;;  %v718_v47 = vmax.f32 %v1908_v63, 0.0 }
 0x224   :  { %914 = vmatpush.bf16.msrb.mxu1 %v1685_v58  ;;  %927 = vmatpush.bf16.msrb.mxu2 %v1668_v43  ;;  %v719_v58 = vmin.f32 %v718_v47, 1.0 }
 0x226   :  { %v785_v23 = vsub.f32 0.0, %v719_v58 }
 0x228   :  { %915 = vmatpush.bf16.msrb.mxu1 %v1697_v5  ;;  %928 = vmatpush.bf16.msrb.mxu2 %v1682_v55 }
 0x22c   :  { %916 = vmatpush.bf16.msrb.mxu1 %v1707_v18  ;;  %929 = vmatpush.bf16.msrb.mxu2 %v1692_v2  ;;  %v723_v2 = vmin.f32 %v722_v53, 1.0 }
 0x22e   :  { %vm796_vm5 = vcmp.ge.f32.partialorder %v723_v2, 0.0  ;;  %vm797_vm6 = vcmp.le.f32.partialorder %v723_v2, 1.0  ;;  %v795_v11 = vsub.f32 0.0, %v723_v2 }
 0x22f   :  { %vm798_vm7 = vmand %vm796_vm5, %vm797_vm6 }
 0x230   :  { %v1227_v49 = vsel %vm798_vm7, 1.0, %v1533_v48 }
 0x26d   :  { %v781_v3 = vpop.f32.mrf.mxu0 }
 0x275   :  { %v783_v17 = vpop.f32.mrf.mxu0 }
 0x27b   :  { %v768_v21 = vpop.f32.mrf.mxu3 }
 0x27c   :  { %v769_v25 = vadd.f32 %v1826_v27, %v768_v21 }
 0x27e   :  { %v782_v26 = vadd.f32 %v781_v3, %v769_v25 }
 0x280   :  { %v793_v34 = vmul.f32 %v1226_v29, %v782_v26 }
 0x282   :  { %v794_v37 = vadd.f32 %v793_v34, %v787_v33 }
 0x283   :  { %v770_v41 = vpop.f32.mrf.mxu3 }
 0x284   :  { %v805_v43 = vmul.f32 0.2, %v794_v37 }
 0x286   :  { %v806_v55 = vadd.f32 %v805_v43, %v721_v14 }
 0x288   :  { %v1228_v1 = vclamp-gez-f32 %v806_v55, 1.0  ;;  %v811_v17 = vmax.f32 %v806_v55, 0.0 }
 0x28a   :  { %v817_v5 = vpack.c.bf16 %v1228_v1, %v1228_v1  ;;  %v812_v26 = vmin.f32 %v811_v17, 1.0 }
 0x28c   :  { %v736_v13 = vpop.f32.mrf.mxu1  ;;  %826 = vmatmul.bf16.vlgmr.msra.gmra.mxu1 %v817_v5  ;;  %839 = vmatmul.bf16.vlgmr.msra.gmra.mxu2 %v817_v5  ;;  %vm879_vm11 = vcmp.ge.f32.partialorder %v812_v26, 0.0  ;;  %vm880_vm12 = vcmp.le.f32.partialorder %v812_v26, 1.0  ;;  %v878_v43 = vsub.f32 0.0, %v812_v26 }
 0x28d   :  { %v737_v18 = vadd.f32 %v1805_v39, %v736_v13  ;;  %vm881_vm13 = vmand %vm879_vm11, %vm880_vm12 }
 0x28e   :  { %v1231_v41 = vsel %vm881_vm13, 1.0, %v1533_v48 }
 0x28f   :  { %v786_v24 = vadd.f32 %v785_v23, %v737_v18 }
 0x291   :  { %v803_v30 = vmul.f32 0.2, %v786_v24 }
 0x292   :  { %v749_v32 = vpop.f32.mrf.mxu2 }
 0x293   :  { %v804_v45 = vadd.f32 %v803_v30, %v719_v58  ;;  %v750_v46 = vadd.f32 %v749_v32, %v1807_v40 }
 0x294   :  { %v738_v50 = vpop.f32.mrf.mxu1 }
 0x295   :  { %v1230_v63 = vclamp-gez-f32 %v804_v45, 1.0  ;;  %v801_v51 = vmul.f32 %v1227_v49, %v750_v46  ;;  %v809_v62 = vmax.f32 %v804_v45, 0.0 }
 0x297   :  { %v802_v52 = vadd.f32 %v801_v51, %v795_v11  ;;  %v849_v56 = vpack.c.bf16 %v1230_v63, %v1230_v63  ;;  %v810_v6 = vmin.f32 %v809_v62, 1.0 }
 0x299   :  { %v807_v44 = vmul.f32 0.2, %v802_v52  ;;  %871 = vmatmul.bf16.vlgmr.msrb.gmra.mxu0 %v849_v56  ;;  %v876_v19 = vsub.f32 0.0, %v810_v6 }
 0x29a   :  { %v751_v57 = vpop.f32.mrf.mxu2 }
 0x29b   :  { %v808_v59 = vadd.f32 %v807_v44, %v723_v2 }
 0x29d   :  { %v1229_v60 = vclamp-gez-f32 %v808_v59, 1.0  ;;  %v813_v0 = vmax.f32 %v808_v59, 0.0 }
 0x29f   :  { %v848_v61 = vpack.c.bf16 %v1229_v60, %v1229_v60  ;;  %v814_v8 = vmin.f32 %v813_v0, 1.0 }
 0x2a1   :  { %858 = vmatmul.bf16.vlgmr.msra.gmra.mxu3 %v848_v61  ;;  %vm887_vm8 = vcmp.ge.f32.partialorder %v814_v8, 0.0  ;;  %vm888_vm9 = vcmp.le.f32.partialorder %v814_v8, 1.0  ;;  %v886_v36 = vsub.f32 0.0, %v814_v8 }
 0x2a2   :  { %vm889_vm10 = vmand %vm887_vm8, %vm888_vm9 }
 0x2a3   :  { %v1232_v10 = vsel %vm889_vm10, 1.0, %v1533_v48 }
 0x309   :  { %v827_v9 = vpop.f32.mrf.mxu1 }
 0x30a   :  { %v828_v12 = vadd.f32 %v1805_v39, %v827_v9 }
 0x30c   :  { %v877_v28 = vadd.f32 %v876_v19, %v828_v12 }
 0x30e   :  { %v894_v31 = vmul.f32 0.2, %v877_v28 }
 0x30f   :  { %v840_v4 = vpop.f32.mrf.mxu2 }
 0x310   :  { %v895_v35 = vadd.f32 %v894_v31, %v810_v6  ;;  %v841_v16 = vadd.f32 %v840_v4, %v1807_v40 }
 0x311   :  { %v829_v54 = vpop.f32.mrf.mxu1 }
 0x312   :  { %v1235_v20 = vclamp-gez-f32 %v895_v35, 1.0  ;;  %v892_v15 = vmul.f32 %v1232_v10, %v841_v16  ;;  %v900_v52 = vmax.f32 %v895_v35, 0.0 }
 0x314   :  { %v893_v22 = vadd.f32 %v892_v15, %v886_v36  ;;  %v940_v38 = vpack.c.bf16 %v1235_v20, %v1235_v20  ;;  %v901_v57 = vmin.f32 %v900_v52, 1.0 }
 0x316   :  { %v872_v42 = vpop.f32.mrf.mxu0  ;;  %v898_v3 = vmul.f32 0.2, %v893_v22  ;;  %962 = vmatmul.bf16.vlgmr.msra.gmra.mxu0 %v940_v38  ;;  %v967_v0 = vsub.f32 0.0, %v901_v57 }
 0x317   :  { %v842_v7 = vpop.f32.mrf.mxu2 }
 0x318   :  { %v899_v14 = vadd.f32 %v898_v3, %v814_v8 }
 0x31a   :  { %v1234_v21 = vclamp-gez-f32 %v899_v14, 1.0  ;;  %v904_v56 = vmax.f32 %v899_v14, 0.0 }
 0x31c   :  { %v939_v25 = vpack.c.bf16 %v1234_v21, %v1234_v21  ;;  %v905_v59 = vmin.f32 %v904_v56, 1.0 }
 0x31e   :  { %v874_v29 = vpop.f32.mrf.mxu0  ;;  %949 = vmatmul.bf16.vlgmr.msrb.gmra.mxu3 %v939_v25  ;;  %vm978_vm1 = vcmp.ge.f32.partialorder %v905_v59, 0.0  ;;  %vm979_vm2 = vcmp.le.f32.partialorder %v905_v59, 1.0  ;;  %v977_v4 = vsub.f32 0.0, %v905_v59 }
 0x31f   :  { %vm980_vm3 = vmand %vm978_vm1, %vm979_vm2 }
 0x320   :  { %v1237_v28 = vsel %vm980_vm3, 1.0, %v1533_v48 }
 0x324   :  { %v859_v33 = vpop.f32.mrf.mxu3 }
 0x325   :  { %v860_v34 = vadd.f32 %v1826_v27, %v859_v33 }
 0x327   :  { %v873_v37 = vadd.f32 %v872_v42, %v860_v34 }
 0x329   :  { %v884_v47 = vmul.f32 %v1231_v41, %v873_v37 }
 0x32b   :  { %v885_v53 = vadd.f32 %v884_v47, %v878_v43 }
 0x32c   :  { %v861_v58 = vpop.f32.mrf.mxu3 }
 0x32d   :  { %v896_v1 = vmul.f32 0.2, %v885_v53 }
 0x32f   :  { %v897_v55 = vadd.f32 %v896_v1, %v812_v26 }
 0x331   :  { %v1233_v2 = vclamp-gez-f32 %v897_v55, 1.0  ;;  %v902_v18 = vmax.f32 %v897_v55, 0.0 }
 0x333   :  { %v908_v5 = vpack.c.bf16 %v1233_v2, %v1233_v2  ;;  %v903_v23 = vmin.f32 %v902_v18, 1.0 }
 0x335   :  { %917 = vmatmul.bf16.vlgmr.msrb.gmra.mxu1 %v908_v5  ;;  %930 = vmatmul.bf16.vlgmr.msrb.gmra.mxu2 %v908_v5  ;;  %vm970_vm14 = vcmp.ge.f32.partialorder %v903_v23, 0.0  ;;  %vm971_vm15 = vcmp.le.f32.partialorder %v903_v23, 1.0  ;;  %v969_v49 = vsub.f32 0.0, %v903_v23 }
 0x336   :  { %vm972_vm0 = vmand %vm970_vm14, %vm971_vm15 }
 0x337   :  { %v1236_v46 = vsel %vm972_vm0, 1.0, %v1533_v48 }
 0x393   :  { %v963_v13 = vpop.f32.mrf.mxu0 }
 0x39b   :  { %v965_v24 = vpop.f32.mrf.mxu0 }
 0x3a1   :  { %v950_v30 = vpop.f32.mrf.mxu3 }
 0x3a2   :  { %v951_v32 = vadd.f32 %v1826_v27, %v950_v30 }
 0x3a4   :  { %v964_v45 = vadd.f32 %v963_v13, %v951_v32 }
 0x3a6   :  { %v975_v50 = vmul.f32 %v1236_v46, %v964_v45 }
 0x3a8   :  { %v976_v63 = vadd.f32 %v975_v50, %v969_v49 }
 0x3a9   :  { %v952_v11 = vpop.f32.mrf.mxu3 }
 0x3aa   :  { %v987_v51 = vmul.f32 0.2, %v976_v63 }
 0x3ac   :  { %v988_v44 = vadd.f32 %v987_v51, %v903_v23 }
 0x3ae   :  { %v993_v27 = vmax.f32 %v988_v44, 0.0 }
 0x3b0   :  { %v994_v60 = vmin.f32 %v993_v27, 1.0 }
 0x3b2   :  { %v918_v61 = vpop.f32.mrf.mxu1  ;;  %998 = vst [vmem:[#allocation14] sm:$0xff] %v994_v60 }
 0x3b3   :  { %v919_v62 = vadd.f32 %v1805_v39, %v918_v61  ;;  %1021 = dma.vmem_to_hbm [thread:$0]  %s1017_s20, 128, %s1019_s23, [#allocation15]  }
 0x3b5   :  { %v968_v6 = vadd.f32 %v967_v0, %v919_v62 }
 0x3b7   :  { %v985_v8 = vmul.f32 0.2, %v968_v6 }
 0x3b8   :  { %v931_v9 = vpop.f32.mrf.mxu2 }
 0x3b9   :  { %v986_v12 = vadd.f32 %v985_v8, %v901_v57  ;;  %v932_v19 = vadd.f32 %v931_v9, %v1807_v40 }
 0x3ba   :  { %v920_v31 = vpop.f32.mrf.mxu1 }
 0x3bb   :  { %v991_v39 = vmax.f32 %v986_v12, 0.0  ;;  %v983_v35 = vmul.f32 %v1237_v28, %v932_v19 }
 0x3bd   :  { %v984_v16 = vadd.f32 %v983_v35, %v977_v4  ;;  %v992_v10 = vmin.f32 %v991_v39, 1.0 }
 0x3bf   :  { %v989_v54 = vmul.f32 0.2, %v984_v16  ;;  %997 = vst [vmem:[#allocation13] sm:$0xff] %v992_v10 }
 0x3c0   :  { %v933_v20 = vpop.f32.mrf.mxu2  ;;  %1010 = dma.vmem_to_hbm [thread:$0]  %s1006_s5, 128, %s1008_s26, [#allocation4]  }
 0x3c1   :  { %v990_v40 = vadd.f32 %v989_v54, %v905_v59 }
 0x3c3   :  { %v995_v48 = vmax.f32 %v990_v40, 0.0 }
 0x3c5   :  { %v996_v36 = vmin.f32 %v995_v48, 1.0 }
 0x3c7   :  { %999 = vst [vmem:[#allocation16] sm:$0xff] %v996_v36 }
 0x3c8   :  { %1032 = dma.vmem_to_hbm [thread:$0]  %s1028_s28, 128, %s1030_s30, [#allocation15]  }
 0x3c9   :  { %1519 = dma.done.wait [#allocation4], 128  }
 0x3ca   :  { %1520 = vsyncadd [#allocation4], 4294967168 }
 0x3cb   :  { %1521 = dma.done.wait [#allocation15], 256  }
 0x3cc   :  { %1522 = vsyncadd [#allocation15], 4294967040 }
 0x3cd   :  { %1045 = vsyncpa [#allocation3], 1 }
 0x3ce   :  { %1046 = vsyncpa [#allocation6], 1 }
 0x3cf   :  { %1047 = vsyncpa [#allocation9], 1 }
 0x3d0   :  { %1048 = vsyncpa [#allocation12], 1 }
 0x3d1   :  { %1049 = vsyncpa [#allocation4], 1 }
 0x3d2   :  { %1050 = vsyncpa [#allocation15], 1 }

</bundles_post_ra>
